<compile_context>
chip_gen: v7x
topology: tpu7x:2x2x1
jax: 0.10.0
libtpu: 0.0.40
codegen_flags: <defaults>
</compile_context>

<pallas_src>
import numpy as np

import jax
import jax.numpy as jnp
from jax.experimental import pallas as pl
from jax.experimental.pallas import tpu as pltpu


# ----------------------------------------------------------------------------
# Fused kernel: one grid step == one batch element.
# ----------------------------------------------------------------------------
def _lenet5_kernel(x_ref, w1_ref, b1_ref, w2_ref, b2_ref,
                   wf1_ref, bf1_ref, wf2_ref, bf2_ref, wf3_ref, bf3_ref,
                   o_ref):
    f32 = jnp.float32

    # ---- conv1 + bias + ReLU, computed per conv-output-row residue (mod 4) --
    # x_ref block: (4, 1, 8, 32*Cin); x_ref[r, 0, m, :] = image row 4*m + r.
    def conv1_rows(s):
        # conv1 output rows oh = 4*n + s, n = 0..6  ->  (7, 168)
        acc = None
        for kh in range(5):
            t = s + kh                                   # needed image row 4n + t
            lhs = x_ref[t % 4, 0, t // 4:t // 4 + 7, :]  # (7, 32*Cin)
            y = jnp.dot(lhs, w1_ref[kh], preferred_element_type=f32)
            acc = y if acc is None else acc + y
        return jnp.maximum(acc + b1_ref[...], 0.0)

    # pool1: H-pool = max of adjacent conv rows (parity branches),
    #        W-pool = max of the two column halves (parity-ordered columns).
    HALF1 = 14 * 6                                       # pooled_w * Cout1
    p1e_full = jnp.maximum(conv1_rows(0), conv1_rows(1))  # pooled rows 0,2,..,12
    p1o_full = jnp.maximum(conv1_rows(2), conv1_rows(3))  # pooled rows 1,3,..,13
    p1e = jnp.maximum(p1e_full[:, :HALF1], p1e_full[:, HALF1:])   # (7, 84)
    p1o = jnp.maximum(p1o_full[:, :HALF1], p1o_full[:, HALF1:])   # (7, 84)

    # ---- conv2 + bias + ReLU (same banded-matmul scheme) --------------------
    def conv2_rows(dh):
        # conv2 output rows oh2 = 2*n + dh, n = 0..4  ->  (5, 160)
        acc = None
        for kh in range(5):
            t = dh + kh                                  # needed pool1 row 2n + t
            src = p1e if t % 2 == 0 else p1o
            lhs = src[t // 2:t // 2 + 5, :]              # (5, 84)
            y = jnp.dot(lhs, w2_ref[kh], preferred_element_type=f32)
            acc = y if acc is None else acc + y
        return jnp.maximum(acc + b2_ref[...], 0.0)

    HALF2 = 5 * 16                                       # pooled_w * Cout2
    p2_full = jnp.maximum(conv2_rows(0), conv2_rows(1))  # (5, 160)
    p2 = jnp.maximum(p2_full[:, :HALF2], p2_full[:, HALF2:])      # (5, 80)

    # ---- fc1 (flatten handled by pre-permuted per-row weight slabs) ---------
    acc = None
    for h in range(5):
        y = jnp.dot(p2[h:h + 1, :], wf1_ref[h], preferred_element_type=f32)
        acc = y if acc is None else acc + y
    f1 = jnp.maximum(acc + bf1_ref[...], 0.0)            # (1, 128), cols >=120 are 0

    # ---- fc2 / fc3 -----------------------------------------------------------
    f2 = jnp.maximum(
        jnp.dot(f1, wf2_ref[...], preferred_element_type=f32) + bf2_ref[...], 0.0)
    f3 = jnp.dot(f2, wf3_ref[...], preferred_element_type=f32) + bf3_ref[...]

    o_ref[0, :, :] = f3                                  # (1, out_dim)


# ----------------------------------------------------------------------------
# Host-side (init-time) weight preprocessing.
# ----------------------------------------------------------------------------
def _conv_band(w, w_in):
    """w: (Cout, Cin, KH, KW) numpy.  Returns (KH, w_in*Cin, OW*Cout) banded
    weight matrices whose output columns are ordered (w-parity, w//2, cout) so
    the 2-wide W-pool is an elementwise max of the two column halves."""
    cout, cin, khn, kwn = w.shape
    ow_n = w_in - kwn + 1
    band = np.zeros((khn, w_in * cin, ow_n * cout), np.float32)
    for kh in range(khn):
        for kw in range(kwn):
            blk = w[:, :, kh, kw].T                      # (Cin, Cout)
            for ow in range(ow_n):
                r0 = (ow + kw) * cin
                band[kh, r0:r0 + cin, ow * cout:(ow + 1) * cout] += blk
    perm = np.array([(2 * owh + pw) * cout + c
                     for pw in (0, 1)
                     for owh in range(ow_n // 2)
                     for c in range(cout)], np.int32)
    return band[:, :, perm]


def init_raw_params(key, out_dim=2, in_channel=3):
    """Raw parameters in the PyTorch layout (deterministic uniform init)."""
    ks = jax.random.split(key, 10)

    def u(k, shape, fan_in):
        bound = 1.0 / float(fan_in) ** 0.5
        return jax.random.uniform(k, shape, jnp.float32, -bound, bound)

    return {
        "conv1_w": u(ks[0], (6, in_channel, 5, 5), in_channel * 25),
        "conv1_b": u(ks[1], (6,), in_channel * 25),
        "conv2_w": u(ks[2], (16, 6, 5, 5), 6 * 25),
        "conv2_b": u(ks[3], (16,), 6 * 25),
        "fc1_w":   u(ks[4], (120, 16 * 5 * 5), 16 * 5 * 5),
        "fc1_b":   u(ks[5], (120,), 16 * 5 * 5),
        "fc2_w":   u(ks[6], (84, 120), 120),
        "fc2_b":   u(ks[7], (84,), 120),
        "fc3_w":   u(ks[8], (out_dim, 84), 84),
        "fc3_b":   u(ks[9], (out_dim,), 84),
    }


def prepare_params(raw):
    """Convert PyTorch-layout params into the fused-kernel layout (done once,
    host-side, with concrete NumPy arrays -- nothing re-laid-out per forward)."""
    r = {k: np.asarray(v, np.float32) for k, v in raw.items()}
    out_dim = r["fc3_w"].shape[0]

    w1band = _conv_band(r["conv1_w"], 32)                 # (5, 32*Cin, 168)
    b1row = np.tile(r["conv1_b"], 28)[None, :]            # (1, 168)
    w2band = _conv_band(r["conv2_w"], 14)                 # (5, 84, 160)
    b2row = np.tile(r["conv2_b"], 10)[None, :]            # (1, 160)

    # fc1: torch flatten order is (c, h, w); kernel's pooled activation is
    # rows = h, cols = w*16 + c  ->  re-order columns and split per h.
    wfc1 = (r["fc1_w"].reshape(120, 16, 5, 5)
            .transpose(2, 3, 1, 0).reshape(5, 80, 120))
    # Lane-dense zero-padding of the FC layers (N, K -> 128).  Exact: padded
    # outputs are relu(0 + 0) = 0 and feed zero-weight rows downstream.
    wfc1 = np.pad(wfc1, ((0, 0), (0, 0), (0, 8))).astype(np.float32)   # (5, 80, 128)
    bfc1 = np.pad(r["fc1_b"], (0, 8))[None, :].astype(np.float32)      # (1, 128)
    wfc2 = np.pad(r["fc2_w"].T, ((0, 8), (0, 44))).astype(np.float32)  # (128, 128)
    bfc2 = np.pad(r["fc2_b"], (0, 44))[None, :].astype(np.float32)     # (1, 128)
    wfc3 = np.pad(r["fc3_w"].T, ((0, 44), (0, 0))).astype(np.float32)  # (128, out)
    bfc3 = r["fc3_b"][None, :].astype(np.float32)                      # (1, out)

    prepped = {"w1band": w1band, "b1row": b1row, "w2band": w2band, "b2row": b2row,
               "wfc1": wfc1, "bfc1": bfc1, "wfc2": wfc2, "bfc2": bfc2,
               "wfc3": wfc3, "bfc3": bfc3}
    return {k: jnp.asarray(v) for k, v in prepped.items()}


# ----------------------------------------------------------------------------
# Forward pass (single pallas_call, batch-parallel grid).
# ----------------------------------------------------------------------------
def lenet5_forward(params, x):
    B, cin, H, W = x.shape
    assert H == 32 and W == 32, "LeNet5 fc1 implies a 32x32 input"
    out_dim = params["bfc3"].shape[-1]
    row_w = W * cin

    # One-time input re-layout (tiny XLA copy of the raw input, fused by XLA):
    # NCHW -> rows = h, cols = w*Cin + cin, rows split by (h mod 4) so the
    # fused kernel only ever needs contiguous row slices.
    xh = jnp.transpose(x, (0, 2, 3, 1)).reshape(B, H, row_w)
    x4 = xh.reshape(B, H // 4, 4, row_w).transpose(2, 0, 1, 3)   # (4, B, 8, row_w)

    def vspec(shape):
        n = len(shape)
        return pl.BlockSpec(shape, lambda b, n=n: (0,) * n)

    out = pl.pallas_call(
        _lenet5_kernel,
        out_shape=jax.ShapeDtypeStruct((B, 1, out_dim), jnp.float32),
        grid=(B,),
        in_specs=[
            pl.BlockSpec((4, 1, H // 4, row_w), lambda b: (0, b, 0, 0)),
            vspec(params["w1band"].shape),
            vspec(params["b1row"].shape),
            vspec(params["w2band"].shape),
            vspec(params["b2row"].shape),
            vspec(params["wfc1"].shape),
            vspec(params["bfc1"].shape),
            vspec(params["wfc2"].shape),
            vspec(params["bfc2"].shape),
            vspec(params["wfc3"].shape),
            vspec(params["bfc3"].shape),
        ],
        out_specs=pl.BlockSpec((1, 1, out_dim), lambda b: (b, 0, 0)),
        compiler_params=pltpu.CompilerParams(
            dimension_semantics=("parallel",)),
    )(x4, params["w1band"], params["b1row"], params["w2band"], params["b2row"],
      params["wfc1"], params["bfc1"], params["wfc2"], params["bfc2"],
      params["wfc3"], params["bfc3"])
    return out.reshape(B, out_dim)


# ----------------------------------------------------------------------------
# Pure-XLA reference (PyTorch semantics) for self-checking.
# ----------------------------------------------------------------------------
def lenet5_reference(raw, x):
    hp = jax.lax.Precision.HIGHEST
    y = jax.lax.conv_general_dilated(
        x, raw["conv1_w"], (1, 1), "VALID",
        dimension_numbers=("NCHW", "OIHW", "NCHW"), precision=hp)
    y = jax.nn.relu(y + raw["conv1_b"].reshape(1, -1, 1, 1))
    y = jax.lax.reduce_window(y, -jnp.inf, jax.lax.max,
                              (1, 1, 2, 2), (1, 1, 2, 2), "VALID")
    y = jax.lax.conv_general_dilated(
        y, raw["conv2_w"], (1, 1), "VALID",
        dimension_numbers=("NCHW", "OIHW", "NCHW"), precision=hp)
    y = jax.nn.relu(y + raw["conv2_b"].reshape(1, -1, 1, 1))
    y = jax.lax.reduce_window(y, -jnp.inf, jax.lax.max,
                              (1, 1, 2, 2), (1, 1, 2, 2), "VALID")
    y = y.reshape(y.shape[0], -1)
    y = jax.nn.relu(jnp.dot(y, raw["fc1_w"].T, precision=hp) + raw["fc1_b"])
    y = jax.nn.relu(jnp.dot(y, raw["fc2_w"].T, precision=hp) + raw["fc2_b"])
    return jnp.dot(y, raw["fc3_w"].T, precision=hp) + raw["fc3_b"]


if __name__ == "__main__":
    key = jax.random.PRNGKey(0)
    pkey, xkey = jax.random.split(key)

    raw = init_raw_params(pkey, out_dim=2, in_channel=3)
    params = prepare_params(raw)
    x = jax.random.normal(xkey, (2, 3, 32, 32), jnp.float32)

    out = jax.block_until_ready(jax.jit(lenet5_forward)(params, x))
    assert out.shape == (2, 2) and out.dtype == jnp.float32

    ref = jax.block_until_ready(jax.jit(lenet5_reference)(raw, x))
    assert np.allclose(np.asarray(out), np.asarray(ref), atol=2e-2, rtol=2e-2), \
        (np.asarray(out), np.asarray(ref))

    print("KERNEL_OK")
</pallas_src>

<mosaic_0001>
module attributes {stable_mosaic.version = 11 : i64} {
  func.func @_lenet5_kernel(%arg0: i32, %arg1: memref<4x1x8x96xf32, #tpu.memory_space<vmem>>, %arg2: memref<5x96x168xf32, #tpu.memory_space<vmem>>, %arg3: memref<1x168xf32, #tpu.memory_space<vmem>>, %arg4: memref<5x84x160xf32, #tpu.memory_space<vmem>>, %arg5: memref<1x160xf32, #tpu.memory_space<vmem>>, %arg6: memref<5x80x128xf32, #tpu.memory_space<vmem>>, %arg7: memref<1x128xf32, #tpu.memory_space<vmem>>, %arg8: memref<128x128xf32, #tpu.memory_space<vmem>>, %arg9: memref<1x128xf32, #tpu.memory_space<vmem>>, %arg10: memref<128x2xf32, #tpu.memory_space<vmem>>, %arg11: memref<1x2xf32, #tpu.memory_space<vmem>>, %arg12: memref<1x1x2xf32, #tpu.memory_space<vmem>>) attributes {dimension_semantics = [#tpu.dimension_semantics<parallel>], iteration_bounds = array<i64: 2>, scalar_prefetch = 0 : i64, scratch_operands = 0 : i64, tpu.core_type = #tpu.core_type<tc>, window_params = [{transform_indices = @transform_0, window_bounds = array<i64: 4, 1, 8, 96>}, {pipeline_mode = #tpu.pipeline_mode<synchronous>, transform_indices = @transform_1, window_bounds = array<i64: 5, 96, 168>}, {pipeline_mode = #tpu.pipeline_mode<synchronous>, transform_indices = @transform_2, window_bounds = array<i64: 1, 168>}, {pipeline_mode = #tpu.pipeline_mode<synchronous>, transform_indices = @transform_3, window_bounds = array<i64: 5, 84, 160>}, {pipeline_mode = #tpu.pipeline_mode<synchronous>, transform_indices = @transform_4, window_bounds = array<i64: 1, 160>}, {pipeline_mode = #tpu.pipeline_mode<synchronous>, transform_indices = @transform_5, window_bounds = array<i64: 5, 80, 128>}, {pipeline_mode = #tpu.pipeline_mode<synchronous>, transform_indices = @transform_6, window_bounds = array<i64: 1, 128>}, {pipeline_mode = #tpu.pipeline_mode<synchronous>, transform_indices = @transform_7, window_bounds = array<i64: 128, 128>}, {pipeline_mode = #tpu.pipeline_mode<synchronous>, transform_indices = @transform_8, window_bounds = array<i64: 1, 128>}, {pipeline_mode = #tpu.pipeline_mode<synchronous>, transform_indices = @transform_9, window_bounds = array<i64: 128, 2>}, {pipeline_mode = #tpu.pipeline_mode<synchronous>, transform_indices = @transform_10, window_bounds = array<i64: 1, 2>}, {transform_indices = @transform_11, window_bounds = array<i64: 1, 1, 2>}]} {
    %c0 = arith.constant 0 : index
    %c0_0 = arith.constant 0 : index
    %c0_1 = arith.constant 0 : index
    %c0_2 = arith.constant 0 : index
    %0 = vector.load %arg1[%c0, %c0_0, %c0_1, %c0_2] : memref<4x1x8x96xf32, #tpu.memory_space<vmem>>, vector<1x1x7x96xf32>
    %1 = vector.shape_cast %0 : vector<1x1x7x96xf32> to vector<7x96xf32>
    %c0_3 = arith.constant 0 : index
    %c0_4 = arith.constant 0 : index
    %c0_5 = arith.constant 0 : index
    %2 = vector.load %arg2[%c0_3, %c0_4, %c0_5] : memref<5x96x168xf32, #tpu.memory_space<vmem>>, vector<1x96x168xf32>
    %3 = vector.shape_cast %2 : vector<1x96x168xf32> to vector<96x168xf32>
    %cst = arith.constant dense<0.000000e+00> : vector<7x168xf32>
    %4 = tpu.matmul %1, %3, %cst {dimension_numbers = #tpu.dot_dimension_numbers<[1], [0], [0], [1], [0, 0, 1, 1], [], []>} : vector<7x96xf32>, vector<96x168xf32>, vector<7x168xf32> -> vector<7x168xf32>
    %c1 = arith.constant 1 : index
    %c0_6 = arith.constant 0 : index
    %c0_7 = arith.constant 0 : index
    %c0_8 = arith.constant 0 : index
    %5 = vector.load %arg1[%c1, %c0_6, %c0_7, %c0_8] : memref<4x1x8x96xf32, #tpu.memory_space<vmem>>, vector<1x1x7x96xf32>
    %6 = vector.shape_cast %5 : vector<1x1x7x96xf32> to vector<7x96xf32>
    %c1_9 = arith.constant 1 : index
    %c0_10 = arith.constant 0 : index
    %c0_11 = arith.constant 0 : index
    %7 = vector.load %arg2[%c1_9, %c0_10, %c0_11] : memref<5x96x168xf32, #tpu.memory_space<vmem>>, vector<1x96x168xf32>
    %8 = vector.shape_cast %7 : vector<1x96x168xf32> to vector<96x168xf32>
    %cst_12 = arith.constant dense<0.000000e+00> : vector<7x168xf32>
    %9 = tpu.matmul %6, %8, %cst_12 {dimension_numbers = #tpu.dot_dimension_numbers<[1], [0], [0], [1], [0, 0, 1, 1], [], []>} : vector<7x96xf32>, vector<96x168xf32>, vector<7x168xf32> -> vector<7x168xf32>
    %10 = arith.addf %4, %9 : vector<7x168xf32>
    %c2 = arith.constant 2 : index
    %c0_13 = arith.constant 0 : index
    %c0_14 = arith.constant 0 : index
    %c0_15 = arith.constant 0 : index
    %11 = vector.load %arg1[%c2, %c0_13, %c0_14, %c0_15] : memref<4x1x8x96xf32, #tpu.memory_space<vmem>>, vector<1x1x7x96xf32>
    %12 = vector.shape_cast %11 : vector<1x1x7x96xf32> to vector<7x96xf32>
    %c2_16 = arith.constant 2 : index
    %c0_17 = arith.constant 0 : index
    %c0_18 = arith.constant 0 : index
    %13 = vector.load %arg2[%c2_16, %c0_17, %c0_18] : memref<5x96x168xf32, #tpu.memory_space<vmem>>, vector<1x96x168xf32>
    %14 = vector.shape_cast %13 : vector<1x96x168xf32> to vector<96x168xf32>
    %cst_19 = arith.constant dense<0.000000e+00> : vector<7x168xf32>
    %15 = tpu.matmul %12, %14, %cst_19 {dimension_numbers = #tpu.dot_dimension_numbers<[1], [0], [0], [1], [0, 0, 1, 1], [], []>} : vector<7x96xf32>, vector<96x168xf32>, vector<7x168xf32> -> vector<7x168xf32>
    %16 = arith.addf %10, %15 : vector<7x168xf32>
    %c3 = arith.constant 3 : index
    %c0_20 = arith.constant 0 : index
    %c0_21 = arith.constant 0 : index
    %c0_22 = arith.constant 0 : index
    %17 = vector.load %arg1[%c3, %c0_20, %c0_21, %c0_22] : memref<4x1x8x96xf32, #tpu.memory_space<vmem>>, vector<1x1x7x96xf32>
    %18 = vector.shape_cast %17 : vector<1x1x7x96xf32> to vector<7x96xf32>
    %c3_23 = arith.constant 3 : index
    %c0_24 = arith.constant 0 : index
    %c0_25 = arith.constant 0 : index
    %19 = vector.load %arg2[%c3_23, %c0_24, %c0_25] : memref<5x96x168xf32, #tpu.memory_space<vmem>>, vector<1x96x168xf32>
    %20 = vector.shape_cast %19 : vector<1x96x168xf32> to vector<96x168xf32>
    %cst_26 = arith.constant dense<0.000000e+00> : vector<7x168xf32>
    %21 = tpu.matmul %18, %20, %cst_26 {dimension_numbers = #tpu.dot_dimension_numbers<[1], [0], [0], [1], [0, 0, 1, 1], [], []>} : vector<7x96xf32>, vector<96x168xf32>, vector<7x168xf32> -> vector<7x168xf32>
    %22 = arith.addf %16, %21 : vector<7x168xf32>
    %c0_27 = arith.constant 0 : index
    %c0_28 = arith.constant 0 : index
    %c1_29 = arith.constant 1 : index
    %c0_30 = arith.constant 0 : index
    %23 = vector.load %arg1[%c0_27, %c0_28, %c1_29, %c0_30] : memref<4x1x8x96xf32, #tpu.memory_space<vmem>>, vector<1x1x7x96xf32>
    %24 = vector.shape_cast %23 : vector<1x1x7x96xf32> to vector<7x96xf32>
    %c4 = arith.constant 4 : index
    %c0_31 = arith.constant 0 : index
    %c0_32 = arith.constant 0 : index
    %25 = vector.load %arg2[%c4, %c0_31, %c0_32] : memref<5x96x168xf32, #tpu.memory_space<vmem>>, vector<1x96x168xf32>
    %26 = vector.shape_cast %25 : vector<1x96x168xf32> to vector<96x168xf32>
    %cst_33 = arith.constant dense<0.000000e+00> : vector<7x168xf32>
    %27 = tpu.matmul %24, %26, %cst_33 {dimension_numbers = #tpu.dot_dimension_numbers<[1], [0], [0], [1], [0, 0, 1, 1], [], []>} : vector<7x96xf32>, vector<96x168xf32>, vector<7x168xf32> -> vector<7x168xf32>
    %28 = arith.addf %22, %27 : vector<7x168xf32>
    %c0_34 = arith.constant 0 : index
    %c0_35 = arith.constant 0 : index
    %29 = vector.load %arg3[%c0_34, %c0_35] : memref<1x168xf32, #tpu.memory_space<vmem>>, vector<1x168xf32>
    %30 = vector.broadcast %29 : vector<1x168xf32> to vector<7x168xf32>
    %31 = arith.addf %28, %30 : vector<7x168xf32>
    %cst_36 = arith.constant 0.000000e+00 : f32
    %32 = vector.broadcast %cst_36 : f32 to vector<7x168xf32>
    %33 = arith.maximumf %31, %32 : vector<7x168xf32>
    %c1_37 = arith.constant 1 : index
    %c0_38 = arith.constant 0 : index
    %c0_39 = arith.constant 0 : index
    %c0_40 = arith.constant 0 : index
    %34 = vector.load %arg1[%c1_37, %c0_38, %c0_39, %c0_40] : memref<4x1x8x96xf32, #tpu.memory_space<vmem>>, vector<1x1x7x96xf32>
    %35 = vector.shape_cast %34 : vector<1x1x7x96xf32> to vector<7x96xf32>
    %c0_41 = arith.constant 0 : index
    %c0_42 = arith.constant 0 : index
    %c0_43 = arith.constant 0 : index
    %36 = vector.load %arg2[%c0_41, %c0_42, %c0_43] : memref<5x96x168xf32, #tpu.memory_space<vmem>>, vector<1x96x168xf32>
    %37 = vector.shape_cast %36 : vector<1x96x168xf32> to vector<96x168xf32>
    %cst_44 = arith.constant dense<0.000000e+00> : vector<7x168xf32>
    %38 = tpu.matmul %35, %37, %cst_44 {dimension_numbers = #tpu.dot_dimension_numbers<[1], [0], [0], [1], [0, 0, 1, 1], [], []>} : vector<7x96xf32>, vector<96x168xf32>, vector<7x168xf32> -> vector<7x168xf32>
    %c2_45 = arith.constant 2 : index
    %c0_46 = arith.constant 0 : index
    %c0_47 = arith.constant 0 : index
    %c0_48 = arith.constant 0 : index
    %39 = vector.load %arg1[%c2_45, %c0_46, %c0_47, %c0_48] : memref<4x1x8x96xf32, #tpu.memory_space<vmem>>, vector<1x1x7x96xf32>
    %40 = vector.shape_cast %39 : vector<1x1x7x96xf32> to vector<7x96xf32>
    %c1_49 = arith.constant 1 : index
    %c0_50 = arith.constant 0 : index
    %c0_51 = arith.constant 0 : index
    %41 = vector.load %arg2[%c1_49, %c0_50, %c0_51] : memref<5x96x168xf32, #tpu.memory_space<vmem>>, vector<1x96x168xf32>
    %42 = vector.shape_cast %41 : vector<1x96x168xf32> to vector<96x168xf32>
    %cst_52 = arith.constant dense<0.000000e+00> : vector<7x168xf32>
    %43 = tpu.matmul %40, %42, %cst_52 {dimension_numbers = #tpu.dot_dimension_numbers<[1], [0], [0], [1], [0, 0, 1, 1], [], []>} : vector<7x96xf32>, vector<96x168xf32>, vector<7x168xf32> -> vector<7x168xf32>
    %44 = arith.addf %38, %43 : vector<7x168xf32>
    %c3_53 = arith.constant 3 : index
    %c0_54 = arith.constant 0 : index
    %c0_55 = arith.constant 0 : index
    %c0_56 = arith.constant 0 : index
    %45 = vector.load %arg1[%c3_53, %c0_54, %c0_55, %c0_56] : memref<4x1x8x96xf32, #tpu.memory_space<vmem>>, vector<1x1x7x96xf32>
    %46 = vector.shape_cast %45 : vector<1x1x7x96xf32> to vector<7x96xf32>
    %c2_57 = arith.constant 2 : index
    %c0_58 = arith.constant 0 : index
    %c0_59 = arith.constant 0 : index
    %47 = vector.load %arg2[%c2_57, %c0_58, %c0_59] : memref<5x96x168xf32, #tpu.memory_space<vmem>>, vector<1x96x168xf32>
    %48 = vector.shape_cast %47 : vector<1x96x168xf32> to vector<96x168xf32>
    %cst_60 = arith.constant dense<0.000000e+00> : vector<7x168xf32>
    %49 = tpu.matmul %46, %48, %cst_60 {dimension_numbers = #tpu.dot_dimension_numbers<[1], [0], [0], [1], [0, 0, 1, 1], [], []>} : vector<7x96xf32>, vector<96x168xf32>, vector<7x168xf32> -> vector<7x168xf32>
    %50 = arith.addf %44, %49 : vector<7x168xf32>
    %c0_61 = arith.constant 0 : index
    %c0_62 = arith.constant 0 : index
    %c1_63 = arith.constant 1 : index
    %c0_64 = arith.constant 0 : index
    %51 = vector.load %arg1[%c0_61, %c0_62, %c1_63, %c0_64] : memref<4x1x8x96xf32, #tpu.memory_space<vmem>>, vector<1x1x7x96xf32>
    %52 = vector.shape_cast %51 : vector<1x1x7x96xf32> to vector<7x96xf32>
    %c3_65 = arith.constant 3 : index
    %c0_66 = arith.constant 0 : index
    %c0_67 = arith.constant 0 : index
    %53 = vector.load %arg2[%c3_65, %c0_66, %c0_67] : memref<5x96x168xf32, #tpu.memory_space<vmem>>, vector<1x96x168xf32>
    %54 = vector.shape_cast %53 : vector<1x96x168xf32> to vector<96x168xf32>
    %cst_68 = arith.constant dense<0.000000e+00> : vector<7x168xf32>
    %55 = tpu.matmul %52, %54, %cst_68 {dimension_numbers = #tpu.dot_dimension_numbers<[1], [0], [0], [1], [0, 0, 1, 1], [], []>} : vector<7x96xf32>, vector<96x168xf32>, vector<7x168xf32> -> vector<7x168xf32>
    %56 = arith.addf %50, %55 : vector<7x168xf32>
    %c1_69 = arith.constant 1 : index
    %c0_70 = arith.constant 0 : index
    %c1_71 = arith.constant 1 : index
    %c0_72 = arith.constant 0 : index
    %57 = vector.load %arg1[%c1_69, %c0_70, %c1_71, %c0_72] : memref<4x1x8x96xf32, #tpu.memory_space<vmem>>, vector<1x1x7x96xf32>
    %58 = vector.shape_cast %57 : vector<1x1x7x96xf32> to vector<7x96xf32>
    %c4_73 = arith.constant 4 : index
    %c0_74 = arith.constant 0 : index
    %c0_75 = arith.constant 0 : index
    %59 = vector.load %arg2[%c4_73, %c0_74, %c0_75] : memref<5x96x168xf32, #tpu.memory_space<vmem>>, vector<1x96x168xf32>
    %60 = vector.shape_cast %59 : vector<1x96x168xf32> to vector<96x168xf32>
    %cst_76 = arith.constant dense<0.000000e+00> : vector<7x168xf32>
    %61 = tpu.matmul %58, %60, %cst_76 {dimension_numbers = #tpu.dot_dimension_numbers<[1], [0], [0], [1], [0, 0, 1, 1], [], []>} : vector<7x96xf32>, vector<96x168xf32>, vector<7x168xf32> -> vector<7x168xf32>
    %62 = arith.addf %56, %61 : vector<7x168xf32>
    %c0_77 = arith.constant 0 : index
    %c0_78 = arith.constant 0 : index
    %63 = vector.load %arg3[%c0_77, %c0_78] : memref<1x168xf32, #tpu.memory_space<vmem>>, vector<1x168xf32>
    %64 = vector.broadcast %63 : vector<1x168xf32> to vector<7x168xf32>
    %65 = arith.addf %62, %64 : vector<7x168xf32>
    %cst_79 = arith.constant 0.000000e+00 : f32
    %66 = vector.broadcast %cst_79 : f32 to vector<7x168xf32>
    %67 = arith.maximumf %65, %66 : vector<7x168xf32>
    %68 = arith.maximumf %33, %67 : vector<7x168xf32>
    %c2_80 = arith.constant 2 : index
    %c0_81 = arith.constant 0 : index
    %c0_82 = arith.constant 0 : index
    %c0_83 = arith.constant 0 : index
    %69 = vector.load %arg1[%c2_80, %c0_81, %c0_82, %c0_83] : memref<4x1x8x96xf32, #tpu.memory_space<vmem>>, vector<1x1x7x96xf32>
    %70 = vector.shape_cast %69 : vector<1x1x7x96xf32> to vector<7x96xf32>
    %c0_84 = arith.constant 0 : index
    %c0_85 = arith.constant 0 : index
    %c0_86 = arith.constant 0 : index
    %71 = vector.load %arg2[%c0_84, %c0_85, %c0_86] : memref<5x96x168xf32, #tpu.memory_space<vmem>>, vector<1x96x168xf32>
    %72 = vector.shape_cast %71 : vector<1x96x168xf32> to vector<96x168xf32>
    %cst_87 = arith.constant dense<0.000000e+00> : vector<7x168xf32>
    %73 = tpu.matmul %70, %72, %cst_87 {dimension_numbers = #tpu.dot_dimension_numbers<[1], [0], [0], [1], [0, 0, 1, 1], [], []>} : vector<7x96xf32>, vector<96x168xf32>, vector<7x168xf32> -> vector<7x168xf32>
    %c3_88 = arith.constant 3 : index
    %c0_89 = arith.constant 0 : index
    %c0_90 = arith.constant 0 : index
    %c0_91 = arith.constant 0 : index
    %74 = vector.load %arg1[%c3_88, %c0_89, %c0_90, %c0_91] : memref<4x1x8x96xf32, #tpu.memory_space<vmem>>, vector<1x1x7x96xf32>
    %75 = vector.shape_cast %74 : vector<1x1x7x96xf32> to vector<7x96xf32>
    %c1_92 = arith.constant 1 : index
    %c0_93 = arith.constant 0 : index
    %c0_94 = arith.constant 0 : index
    %76 = vector.load %arg2[%c1_92, %c0_93, %c0_94] : memref<5x96x168xf32, #tpu.memory_space<vmem>>, vector<1x96x168xf32>
    %77 = vector.shape_cast %76 : vector<1x96x168xf32> to vector<96x168xf32>
    %cst_95 = arith.constant dense<0.000000e+00> : vector<7x168xf32>
    %78 = tpu.matmul %75, %77, %cst_95 {dimension_numbers = #tpu.dot_dimension_numbers<[1], [0], [0], [1], [0, 0, 1, 1], [], []>} : vector<7x96xf32>, vector<96x168xf32>, vector<7x168xf32> -> vector<7x168xf32>
    %79 = arith.addf %73, %78 : vector<7x168xf32>
    %c0_96 = arith.constant 0 : index
    %c0_97 = arith.constant 0 : index
    %c1_98 = arith.constant 1 : index
    %c0_99 = arith.constant 0 : index
    %80 = vector.load %arg1[%c0_96, %c0_97, %c1_98, %c0_99] : memref<4x1x8x96xf32, #tpu.memory_space<vmem>>, vector<1x1x7x96xf32>
    %81 = vector.shape_cast %80 : vector<1x1x7x96xf32> to vector<7x96xf32>
    %c2_100 = arith.constant 2 : index
    %c0_101 = arith.constant 0 : index
    %c0_102 = arith.constant 0 : index
    %82 = vector.load %arg2[%c2_100, %c0_101, %c0_102] : memref<5x96x168xf32, #tpu.memory_space<vmem>>, vector<1x96x168xf32>
    %83 = vector.shape_cast %82 : vector<1x96x168xf32> to vector<96x168xf32>
    %cst_103 = arith.constant dense<0.000000e+00> : vector<7x168xf32>
    %84 = tpu.matmul %81, %83, %cst_103 {dimension_numbers = #tpu.dot_dimension_numbers<[1], [0], [0], [1], [0, 0, 1, 1], [], []>} : vector<7x96xf32>, vector<96x168xf32>, vector<7x168xf32> -> vector<7x168xf32>
    %85 = arith.addf %79, %84 : vector<7x168xf32>
    %c1_104 = arith.constant 1 : index
    %c0_105 = arith.constant 0 : index
    %c1_106 = arith.constant 1 : index
    %c0_107 = arith.constant 0 : index
    %86 = vector.load %arg1[%c1_104, %c0_105, %c1_106, %c0_107] : memref<4x1x8x96xf32, #tpu.memory_space<vmem>>, vector<1x1x7x96xf32>
    %87 = vector.shape_cast %86 : vector<1x1x7x96xf32> to vector<7x96xf32>
    %c3_108 = arith.constant 3 : index
    %c0_109 = arith.constant 0 : index
    %c0_110 = arith.constant 0 : index
    %88 = vector.load %arg2[%c3_108, %c0_109, %c0_110] : memref<5x96x168xf32, #tpu.memory_space<vmem>>, vector<1x96x168xf32>
    %89 = vector.shape_cast %88 : vector<1x96x168xf32> to vector<96x168xf32>
    %cst_111 = arith.constant dense<0.000000e+00> : vector<7x168xf32>
    %90 = tpu.matmul %87, %89, %cst_111 {dimension_numbers = #tpu.dot_dimension_numbers<[1], [0], [0], [1], [0, 0, 1, 1], [], []>} : vector<7x96xf32>, vector<96x168xf32>, vector<7x168xf32> -> vector<7x168xf32>
    %91 = arith.addf %85, %90 : vector<7x168xf32>
    %c2_112 = arith.constant 2 : index
    %c0_113 = arith.constant 0 : index
    %c1_114 = arith.constant 1 : index
    %c0_115 = arith.constant 0 : index
    %92 = vector.load %arg1[%c2_112, %c0_113, %c1_114, %c0_115] : memref<4x1x8x96xf32, #tpu.memory_space<vmem>>, vector<1x1x7x96xf32>
    %93 = vector.shape_cast %92 : vector<1x1x7x96xf32> to vector<7x96xf32>
    %c4_116 = arith.constant 4 : index
    %c0_117 = arith.constant 0 : index
    %c0_118 = arith.constant 0 : index
    %94 = vector.load %arg2[%c4_116, %c0_117, %c0_118] : memref<5x96x168xf32, #tpu.memory_space<vmem>>, vector<1x96x168xf32>
    %95 = vector.shape_cast %94 : vector<1x96x168xf32> to vector<96x168xf32>
    %cst_119 = arith.constant dense<0.000000e+00> : vector<7x168xf32>
    %96 = tpu.matmul %93, %95, %cst_119 {dimension_numbers = #tpu.dot_dimension_numbers<[1], [0], [0], [1], [0, 0, 1, 1], [], []>} : vector<7x96xf32>, vector<96x168xf32>, vector<7x168xf32> -> vector<7x168xf32>
    %97 = arith.addf %91, %96 : vector<7x168xf32>
    %c0_120 = arith.constant 0 : index
    %c0_121 = arith.constant 0 : index
    %98 = vector.load %arg3[%c0_120, %c0_121] : memref<1x168xf32, #tpu.memory_space<vmem>>, vector<1x168xf32>
    %99 = vector.broadcast %98 : vector<1x168xf32> to vector<7x168xf32>
    %100 = arith.addf %97, %99 : vector<7x168xf32>
    %cst_122 = arith.constant 0.000000e+00 : f32
    %101 = vector.broadcast %cst_122 : f32 to vector<7x168xf32>
    %102 = arith.maximumf %100, %101 : vector<7x168xf32>
    %c3_123 = arith.constant 3 : index
    %c0_124 = arith.constant 0 : index
    %c0_125 = arith.constant 0 : index
    %c0_126 = arith.constant 0 : index
    %103 = vector.load %arg1[%c3_123, %c0_124, %c0_125, %c0_126] : memref<4x1x8x96xf32, #tpu.memory_space<vmem>>, vector<1x1x7x96xf32>
    %104 = vector.shape_cast %103 : vector<1x1x7x96xf32> to vector<7x96xf32>
    %c0_127 = arith.constant 0 : index
    %c0_128 = arith.constant 0 : index
    %c0_129 = arith.constant 0 : index
    %105 = vector.load %arg2[%c0_127, %c0_128, %c0_129] : memref<5x96x168xf32, #tpu.memory_space<vmem>>, vector<1x96x168xf32>
    %106 = vector.shape_cast %105 : vector<1x96x168xf32> to vector<96x168xf32>
    %cst_130 = arith.constant dense<0.000000e+00> : vector<7x168xf32>
    %107 = tpu.matmul %104, %106, %cst_130 {dimension_numbers = #tpu.dot_dimension_numbers<[1], [0], [0], [1], [0, 0, 1, 1], [], []>} : vector<7x96xf32>, vector<96x168xf32>, vector<7x168xf32> -> vector<7x168xf32>
    %c0_131 = arith.constant 0 : index
    %c0_132 = arith.constant 0 : index
    %c1_133 = arith.constant 1 : index
    %c0_134 = arith.constant 0 : index
    %108 = vector.load %arg1[%c0_131, %c0_132, %c1_133, %c0_134] : memref<4x1x8x96xf32, #tpu.memory_space<vmem>>, vector<1x1x7x96xf32>
    %109 = vector.shape_cast %108 : vector<1x1x7x96xf32> to vector<7x96xf32>
    %c1_135 = arith.constant 1 : index
    %c0_136 = arith.constant 0 : index
    %c0_137 = arith.constant 0 : index
    %110 = vector.load %arg2[%c1_135, %c0_136, %c0_137] : memref<5x96x168xf32, #tpu.memory_space<vmem>>, vector<1x96x168xf32>
    %111 = vector.shape_cast %110 : vector<1x96x168xf32> to vector<96x168xf32>
    %cst_138 = arith.constant dense<0.000000e+00> : vector<7x168xf32>
    %112 = tpu.matmul %109, %111, %cst_138 {dimension_numbers = #tpu.dot_dimension_numbers<[1], [0], [0], [1], [0, 0, 1, 1], [], []>} : vector<7x96xf32>, vector<96x168xf32>, vector<7x168xf32> -> vector<7x168xf32>
    %113 = arith.addf %107, %112 : vector<7x168xf32>
    %c1_139 = arith.constant 1 : index
    %c0_140 = arith.constant 0 : index
    %c1_141 = arith.constant 1 : index
    %c0_142 = arith.constant 0 : index
    %114 = vector.load %arg1[%c1_139, %c0_140, %c1_141, %c0_142] : memref<4x1x8x96xf32, #tpu.memory_space<vmem>>, vector<1x1x7x96xf32>
    %115 = vector.shape_cast %114 : vector<1x1x7x96xf32> to vector<7x96xf32>
    %c2_143 = arith.constant 2 : index
    %c0_144 = arith.constant 0 : index
    %c0_145 = arith.constant 0 : index
    %116 = vector.load %arg2[%c2_143, %c0_144, %c0_145] : memref<5x96x168xf32, #tpu.memory_space<vmem>>, vector<1x96x168xf32>
    %117 = vector.shape_cast %116 : vector<1x96x168xf32> to vector<96x168xf32>
    %cst_146 = arith.constant dense<0.000000e+00> : vector<7x168xf32>
    %118 = tpu.matmul %115, %117, %cst_146 {dimension_numbers = #tpu.dot_dimension_numbers<[1], [0], [0], [1], [0, 0, 1, 1], [], []>} : vector<7x96xf32>, vector<96x168xf32>, vector<7x168xf32> -> vector<7x168xf32>
    %119 = arith.addf %113, %118 : vector<7x168xf32>
    %c2_147 = arith.constant 2 : index
    %c0_148 = arith.constant 0 : index
    %c1_149 = arith.constant 1 : index
    %c0_150 = arith.constant 0 : index
    %120 = vector.load %arg1[%c2_147, %c0_148, %c1_149, %c0_150] : memref<4x1x8x96xf32, #tpu.memory_space<vmem>>, vector<1x1x7x96xf32>
    %121 = vector.shape_cast %120 : vector<1x1x7x96xf32> to vector<7x96xf32>
    %c3_151 = arith.constant 3 : index
    %c0_152 = arith.constant 0 : index
    %c0_153 = arith.constant 0 : index
    %122 = vector.load %arg2[%c3_151, %c0_152, %c0_153] : memref<5x96x168xf32, #tpu.memory_space<vmem>>, vector<1x96x168xf32>
    %123 = vector.shape_cast %122 : vector<1x96x168xf32> to vector<96x168xf32>
    %cst_154 = arith.constant dense<0.000000e+00> : vector<7x168xf32>
    %124 = tpu.matmul %121, %123, %cst_154 {dimension_numbers = #tpu.dot_dimension_numbers<[1], [0], [0], [1], [0, 0, 1, 1], [], []>} : vector<7x96xf32>, vector<96x168xf32>, vector<7x168xf32> -> vector<7x168xf32>
    %125 = arith.addf %119, %124 : vector<7x168xf32>
    %c3_155 = arith.constant 3 : index
    %c0_156 = arith.constant 0 : index
    %c1_157 = arith.constant 1 : index
    %c0_158 = arith.constant 0 : index
    %126 = vector.load %arg1[%c3_155, %c0_156, %c1_157, %c0_158] : memref<4x1x8x96xf32, #tpu.memory_space<vmem>>, vector<1x1x7x96xf32>
    %127 = vector.shape_cast %126 : vector<1x1x7x96xf32> to vector<7x96xf32>
    %c4_159 = arith.constant 4 : index
    %c0_160 = arith.constant 0 : index
    %c0_161 = arith.constant 0 : index
    %128 = vector.load %arg2[%c4_159, %c0_160, %c0_161] : memref<5x96x168xf32, #tpu.memory_space<vmem>>, vector<1x96x168xf32>
    %129 = vector.shape_cast %128 : vector<1x96x168xf32> to vector<96x168xf32>
    %cst_162 = arith.constant dense<0.000000e+00> : vector<7x168xf32>
    %130 = tpu.matmul %127, %129, %cst_162 {dimension_numbers = #tpu.dot_dimension_numbers<[1], [0], [0], [1], [0, 0, 1, 1], [], []>} : vector<7x96xf32>, vector<96x168xf32>, vector<7x168xf32> -> vector<7x168xf32>
    %131 = arith.addf %125, %130 : vector<7x168xf32>
    %c0_163 = arith.constant 0 : index
    %c0_164 = arith.constant 0 : index
    %132 = vector.load %arg3[%c0_163, %c0_164] : memref<1x168xf32, #tpu.memory_space<vmem>>, vector<1x168xf32>
    %133 = vector.broadcast %132 : vector<1x168xf32> to vector<7x168xf32>
    %134 = arith.addf %131, %133 : vector<7x168xf32>
    %cst_165 = arith.constant 0.000000e+00 : f32
    %135 = vector.broadcast %cst_165 : f32 to vector<7x168xf32>
    %136 = arith.maximumf %134, %135 : vector<7x168xf32>
    %137 = arith.maximumf %102, %136 : vector<7x168xf32>
    %138 = vector.extract_strided_slice %68 {offsets = [0, 0], sizes = [7, 84], strides = [1, 1]} : vector<7x168xf32> to vector<7x84xf32>
    %139 = vector.extract_strided_slice %68 {offsets = [0, 84], sizes = [7, 84], strides = [1, 1]} : vector<7x168xf32> to vector<7x84xf32>
    %140 = arith.maximumf %138, %139 : vector<7x84xf32>
    %141 = vector.extract_strided_slice %137 {offsets = [0, 0], sizes = [7, 84], strides = [1, 1]} : vector<7x168xf32> to vector<7x84xf32>
    %142 = vector.extract_strided_slice %137 {offsets = [0, 84], sizes = [7, 84], strides = [1, 1]} : vector<7x168xf32> to vector<7x84xf32>
    %143 = arith.maximumf %141, %142 : vector<7x84xf32>
    %144 = vector.extract_strided_slice %140 {offsets = [0, 0], sizes = [5, 84], strides = [1, 1]} : vector<7x84xf32> to vector<5x84xf32>
    %c0_166 = arith.constant 0 : index
    %c0_167 = arith.constant 0 : index
    %c0_168 = arith.constant 0 : index
    %145 = vector.load %arg4[%c0_166, %c0_167, %c0_168] : memref<5x84x160xf32, #tpu.memory_space<vmem>>, vector<1x84x160xf32>
    %146 = vector.shape_cast %145 : vector<1x84x160xf32> to vector<84x160xf32>
    %cst_169 = arith.constant dense<0.000000e+00> : vector<5x160xf32>
    %147 = tpu.matmul %144, %146, %cst_169 {dimension_numbers = #tpu.dot_dimension_numbers<[1], [0], [0], [1], [0, 0, 1, 1], [], []>} : vector<5x84xf32>, vector<84x160xf32>, vector<5x160xf32> -> vector<5x160xf32>
    %148 = vector.extract_strided_slice %143 {offsets = [0, 0], sizes = [5, 84], strides = [1, 1]} : vector<7x84xf32> to vector<5x84xf32>
    %c1_170 = arith.constant 1 : index
    %c0_171 = arith.constant 0 : index
    %c0_172 = arith.constant 0 : index
    %149 = vector.load %arg4[%c1_170, %c0_171, %c0_172] : memref<5x84x160xf32, #tpu.memory_space<vmem>>, vector<1x84x160xf32>
    %150 = vector.shape_cast %149 : vector<1x84x160xf32> to vector<84x160xf32>
    %cst_173 = arith.constant dense<0.000000e+00> : vector<5x160xf32>
    %151 = tpu.matmul %148, %150, %cst_173 {dimension_numbers = #tpu.dot_dimension_numbers<[1], [0], [0], [1], [0, 0, 1, 1], [], []>} : vector<5x84xf32>, vector<84x160xf32>, vector<5x160xf32> -> vector<5x160xf32>
    %152 = arith.addf %147, %151 : vector<5x160xf32>
    %153 = vector.extract_strided_slice %140 {offsets = [1, 0], sizes = [5, 84], strides = [1, 1]} : vector<7x84xf32> to vector<5x84xf32>
    %c2_174 = arith.constant 2 : index
    %c0_175 = arith.constant 0 : index
    %c0_176 = arith.constant 0 : index
    %154 = vector.load %arg4[%c2_174, %c0_175, %c0_176] : memref<5x84x160xf32, #tpu.memory_space<vmem>>, vector<1x84x160xf32>
    %155 = vector.shape_cast %154 : vector<1x84x160xf32> to vector<84x160xf32>
    %cst_177 = arith.constant dense<0.000000e+00> : vector<5x160xf32>
    %156 = tpu.matmul %153, %155, %cst_177 {dimension_numbers = #tpu.dot_dimension_numbers<[1], [0], [0], [1], [0, 0, 1, 1], [], []>} : vector<5x84xf32>, vector<84x160xf32>, vector<5x160xf32> -> vector<5x160xf32>
    %157 = arith.addf %152, %156 : vector<5x160xf32>
    %158 = vector.extract_strided_slice %143 {offsets = [1, 0], sizes = [5, 84], strides = [1, 1]} : vector<7x84xf32> to vector<5x84xf32>
    %c3_178 = arith.constant 3 : index
    %c0_179 = arith.constant 0 : index
    %c0_180 = arith.constant 0 : index
    %159 = vector.load %arg4[%c3_178, %c0_179, %c0_180] : memref<5x84x160xf32, #tpu.memory_space<vmem>>, vector<1x84x160xf32>
    %160 = vector.shape_cast %159 : vector<1x84x160xf32> to vector<84x160xf32>
    %cst_181 = arith.constant dense<0.000000e+00> : vector<5x160xf32>
    %161 = tpu.matmul %158, %160, %cst_181 {dimension_numbers = #tpu.dot_dimension_numbers<[1], [0], [0], [1], [0, 0, 1, 1], [], []>} : vector<5x84xf32>, vector<84x160xf32>, vector<5x160xf32> -> vector<5x160xf32>
    %162 = arith.addf %157, %161 : vector<5x160xf32>
    %163 = vector.extract_strided_slice %140 {offsets = [2, 0], sizes = [5, 84], strides = [1, 1]} : vector<7x84xf32> to vector<5x84xf32>
    %c4_182 = arith.constant 4 : index
    %c0_183 = arith.constant 0 : index
    %c0_184 = arith.constant 0 : index
    %164 = vector.load %arg4[%c4_182, %c0_183, %c0_184] : memref<5x84x160xf32, #tpu.memory_space<vmem>>, vector<1x84x160xf32>
    %165 = vector.shape_cast %164 : vector<1x84x160xf32> to vector<84x160xf32>
    %cst_185 = arith.constant dense<0.000000e+00> : vector<5x160xf32>
    %166 = tpu.matmul %163, %165, %cst_185 {dimension_numbers = #tpu.dot_dimension_numbers<[1], [0], [0], [1], [0, 0, 1, 1], [], []>} : vector<5x84xf32>, vector<84x160xf32>, vector<5x160xf32> -> vector<5x160xf32>
    %167 = arith.addf %162, %166 : vector<5x160xf32>
    %c0_186 = arith.constant 0 : index
    %c0_187 = arith.constant 0 : index
    %168 = vector.load %arg5[%c0_186, %c0_187] : memref<1x160xf32, #tpu.memory_space<vmem>>, vector<1x160xf32>
    %169 = vector.broadcast %168 : vector<1x160xf32> to vector<5x160xf32>
    %170 = arith.addf %167, %169 : vector<5x160xf32>
    %cst_188 = arith.constant 0.000000e+00 : f32
    %171 = vector.broadcast %cst_188 : f32 to vector<5x160xf32>
    %172 = arith.maximumf %170, %171 : vector<5x160xf32>
    %173 = vector.extract_strided_slice %143 {offsets = [0, 0], sizes = [5, 84], strides = [1, 1]} : vector<7x84xf32> to vector<5x84xf32>
    %c0_189 = arith.constant 0 : index
    %c0_190 = arith.constant 0 : index
    %c0_191 = arith.constant 0 : index
    %174 = vector.load %arg4[%c0_189, %c0_190, %c0_191] : memref<5x84x160xf32, #tpu.memory_space<vmem>>, vector<1x84x160xf32>
    %175 = vector.shape_cast %174 : vector<1x84x160xf32> to vector<84x160xf32>
    %cst_192 = arith.constant dense<0.000000e+00> : vector<5x160xf32>
    %176 = tpu.matmul %173, %175, %cst_192 {dimension_numbers = #tpu.dot_dimension_numbers<[1], [0], [0], [1], [0, 0, 1, 1], [], []>} : vector<5x84xf32>, vector<84x160xf32>, vector<5x160xf32> -> vector<5x160xf32>
    %177 = vector.extract_strided_slice %140 {offsets = [1, 0], sizes = [5, 84], strides = [1, 1]} : vector<7x84xf32> to vector<5x84xf32>
    %c1_193 = arith.constant 1 : index
    %c0_194 = arith.constant 0 : index
    %c0_195 = arith.constant 0 : index
    %178 = vector.load %arg4[%c1_193, %c0_194, %c0_195] : memref<5x84x160xf32, #tpu.memory_space<vmem>>, vector<1x84x160xf32>
    %179 = vector.shape_cast %178 : vector<1x84x160xf32> to vector<84x160xf32>
    %cst_196 = arith.constant dense<0.000000e+00> : vector<5x160xf32>
    %180 = tpu.matmul %177, %179, %cst_196 {dimension_numbers = #tpu.dot_dimension_numbers<[1], [0], [0], [1], [0, 0, 1, 1], [], []>} : vector<5x84xf32>, vector<84x160xf32>, vector<5x160xf32> -> vector<5x160xf32>
    %181 = arith.addf %176, %180 : vector<5x160xf32>
    %182 = vector.extract_strided_slice %143 {offsets = [1, 0], sizes = [5, 84], strides = [1, 1]} : vector<7x84xf32> to vector<5x84xf32>
    %c2_197 = arith.constant 2 : index
    %c0_198 = arith.constant 0 : index
    %c0_199 = arith.constant 0 : index
    %183 = vector.load %arg4[%c2_197, %c0_198, %c0_199] : memref<5x84x160xf32, #tpu.memory_space<vmem>>, vector<1x84x160xf32>
    %184 = vector.shape_cast %183 : vector<1x84x160xf32> to vector<84x160xf32>
    %cst_200 = arith.constant dense<0.000000e+00> : vector<5x160xf32>
    %185 = tpu.matmul %182, %184, %cst_200 {dimension_numbers = #tpu.dot_dimension_numbers<[1], [0], [0], [1], [0, 0, 1, 1], [], []>} : vector<5x84xf32>, vector<84x160xf32>, vector<5x160xf32> -> vector<5x160xf32>
    %186 = arith.addf %181, %185 : vector<5x160xf32>
    %187 = vector.extract_strided_slice %140 {offsets = [2, 0], sizes = [5, 84], strides = [1, 1]} : vector<7x84xf32> to vector<5x84xf32>
    %c3_201 = arith.constant 3 : index
    %c0_202 = arith.constant 0 : index
    %c0_203 = arith.constant 0 : index
    %188 = vector.load %arg4[%c3_201, %c0_202, %c0_203] : memref<5x84x160xf32, #tpu.memory_space<vmem>>, vector<1x84x160xf32>
    %189 = vector.shape_cast %188 : vector<1x84x160xf32> to vector<84x160xf32>
    %cst_204 = arith.constant dense<0.000000e+00> : vector<5x160xf32>
    %190 = tpu.matmul %187, %189, %cst_204 {dimension_numbers = #tpu.dot_dimension_numbers<[1], [0], [0], [1], [0, 0, 1, 1], [], []>} : vector<5x84xf32>, vector<84x160xf32>, vector<5x160xf32> -> vector<5x160xf32>
    %191 = arith.addf %186, %190 : vector<5x160xf32>
    %192 = vector.extract_strided_slice %143 {offsets = [2, 0], sizes = [5, 84], strides = [1, 1]} : vector<7x84xf32> to vector<5x84xf32>
    %c4_205 = arith.constant 4 : index
    %c0_206 = arith.constant 0 : index
    %c0_207 = arith.constant 0 : index
    %193 = vector.load %arg4[%c4_205, %c0_206, %c0_207] : memref<5x84x160xf32, #tpu.memory_space<vmem>>, vector<1x84x160xf32>
    %194 = vector.shape_cast %193 : vector<1x84x160xf32> to vector<84x160xf32>
    %cst_208 = arith.constant dense<0.000000e+00> : vector<5x160xf32>
    %195 = tpu.matmul %192, %194, %cst_208 {dimension_numbers = #tpu.dot_dimension_numbers<[1], [0], [0], [1], [0, 0, 1, 1], [], []>} : vector<5x84xf32>, vector<84x160xf32>, vector<5x160xf32> -> vector<5x160xf32>
    %196 = arith.addf %191, %195 : vector<5x160xf32>
    %c0_209 = arith.constant 0 : index
    %c0_210 = arith.constant 0 : index
    %197 = vector.load %arg5[%c0_209, %c0_210] : memref<1x160xf32, #tpu.memory_space<vmem>>, vector<1x160xf32>
    %198 = vector.broadcast %197 : vector<1x160xf32> to vector<5x160xf32>
    %199 = arith.addf %196, %198 : vector<5x160xf32>
    %cst_211 = arith.constant 0.000000e+00 : f32
    %200 = vector.broadcast %cst_211 : f32 to vector<5x160xf32>
    %201 = arith.maximumf %199, %200 : vector<5x160xf32>
    %202 = arith.maximumf %172, %201 : vector<5x160xf32>
    %203 = vector.extract_strided_slice %202 {offsets = [0, 0], sizes = [5, 80], strides = [1, 1]} : vector<5x160xf32> to vector<5x80xf32>
    %204 = vector.extract_strided_slice %202 {offsets = [0, 80], sizes = [5, 80], strides = [1, 1]} : vector<5x160xf32> to vector<5x80xf32>
    %205 = arith.maximumf %203, %204 : vector<5x80xf32>
    %206 = vector.extract_strided_slice %205 {offsets = [0, 0], sizes = [1, 80], strides = [1, 1]} : vector<5x80xf32> to vector<1x80xf32>
    %c0_212 = arith.constant 0 : index
    %c0_213 = arith.constant 0 : index
    %c0_214 = arith.constant 0 : index
    %207 = vector.load %arg6[%c0_212, %c0_213, %c0_214] : memref<5x80x128xf32, #tpu.memory_space<vmem>>, vector<1x80x128xf32>
    %208 = vector.shape_cast %207 : vector<1x80x128xf32> to vector<80x128xf32>
    %cst_215 = arith.constant dense<0.000000e+00> : vector<1x128xf32>
    %209 = tpu.matmul %206, %208, %cst_215 {dimension_numbers = #tpu.dot_dimension_numbers<[1], [0], [0], [1], [0, 0, 1, 1], [], []>} : vector<1x80xf32>, vector<80x128xf32>, vector<1x128xf32> -> vector<1x128xf32>
    %210 = vector.extract_strided_slice %205 {offsets = [1, 0], sizes = [1, 80], strides = [1, 1]} : vector<5x80xf32> to vector<1x80xf32>
    %c1_216 = arith.constant 1 : index
    %c0_217 = arith.constant 0 : index
    %c0_218 = arith.constant 0 : index
    %211 = vector.load %arg6[%c1_216, %c0_217, %c0_218] : memref<5x80x128xf32, #tpu.memory_space<vmem>>, vector<1x80x128xf32>
    %212 = vector.shape_cast %211 : vector<1x80x128xf32> to vector<80x128xf32>
    %cst_219 = arith.constant dense<0.000000e+00> : vector<1x128xf32>
    %213 = tpu.matmul %210, %212, %cst_219 {dimension_numbers = #tpu.dot_dimension_numbers<[1], [0], [0], [1], [0, 0, 1, 1], [], []>} : vector<1x80xf32>, vector<80x128xf32>, vector<1x128xf32> -> vector<1x128xf32>
    %214 = arith.addf %209, %213 : vector<1x128xf32>
    %215 = vector.extract_strided_slice %205 {offsets = [2, 0], sizes = [1, 80], strides = [1, 1]} : vector<5x80xf32> to vector<1x80xf32>
    %c2_220 = arith.constant 2 : index
    %c0_221 = arith.constant 0 : index
    %c0_222 = arith.constant 0 : index
    %216 = vector.load %arg6[%c2_220, %c0_221, %c0_222] : memref<5x80x128xf32, #tpu.memory_space<vmem>>, vector<1x80x128xf32>
    %217 = vector.shape_cast %216 : vector<1x80x128xf32> to vector<80x128xf32>
    %cst_223 = arith.constant dense<0.000000e+00> : vector<1x128xf32>
    %218 = tpu.matmul %215, %217, %cst_223 {dimension_numbers = #tpu.dot_dimension_numbers<[1], [0], [0], [1], [0, 0, 1, 1], [], []>} : vector<1x80xf32>, vector<80x128xf32>, vector<1x128xf32> -> vector<1x128xf32>
    %219 = arith.addf %214, %218 : vector<1x128xf32>
    %220 = vector.extract_strided_slice %205 {offsets = [3, 0], sizes = [1, 80], strides = [1, 1]} : vector<5x80xf32> to vector<1x80xf32>
    %c3_224 = arith.constant 3 : index
    %c0_225 = arith.constant 0 : index
    %c0_226 = arith.constant 0 : index
    %221 = vector.load %arg6[%c3_224, %c0_225, %c0_226] : memref<5x80x128xf32, #tpu.memory_space<vmem>>, vector<1x80x128xf32>
    %222 = vector.shape_cast %221 : vector<1x80x128xf32> to vector<80x128xf32>
    %cst_227 = arith.constant dense<0.000000e+00> : vector<1x128xf32>
    %223 = tpu.matmul %220, %222, %cst_227 {dimension_numbers = #tpu.dot_dimension_numbers<[1], [0], [0], [1], [0, 0, 1, 1], [], []>} : vector<1x80xf32>, vector<80x128xf32>, vector<1x128xf32> -> vector<1x128xf32>
    %224 = arith.addf %219, %223 : vector<1x128xf32>
    %225 = vector.extract_strided_slice %205 {offsets = [4, 0], sizes = [1, 80], strides = [1, 1]} : vector<5x80xf32> to vector<1x80xf32>
    %c4_228 = arith.constant 4 : index
    %c0_229 = arith.constant 0 : index
    %c0_230 = arith.constant 0 : index
    %226 = vector.load %arg6[%c4_228, %c0_229, %c0_230] : memref<5x80x128xf32, #tpu.memory_space<vmem>>, vector<1x80x128xf32>
    %227 = vector.shape_cast %226 : vector<1x80x128xf32> to vector<80x128xf32>
    %cst_231 = arith.constant dense<0.000000e+00> : vector<1x128xf32>
    %228 = tpu.matmul %225, %227, %cst_231 {dimension_numbers = #tpu.dot_dimension_numbers<[1], [0], [0], [1], [0, 0, 1, 1], [], []>} : vector<1x80xf32>, vector<80x128xf32>, vector<1x128xf32> -> vector<1x128xf32>
    %229 = arith.addf %224, %228 : vector<1x128xf32>
    %c0_232 = arith.constant 0 : index
    %c0_233 = arith.constant 0 : index
    %230 = vector.load %arg7[%c0_232, %c0_233] : memref<1x128xf32, #tpu.memory_space<vmem>>, vector<1x128xf32>
    %231 = arith.addf %229, %230 : vector<1x128xf32>
    %cst_234 = arith.constant 0.000000e+00 : f32
    %232 = vector.broadcast %cst_234 : f32 to vector<1x128xf32>
    %233 = arith.maximumf %231, %232 : vector<1x128xf32>
    %c0_235 = arith.constant 0 : index
    %c0_236 = arith.constant 0 : index
    %234 = vector.load %arg8[%c0_235, %c0_236] : memref<128x128xf32, #tpu.memory_space<vmem>>, vector<128x128xf32>
    %cst_237 = arith.constant dense<0.000000e+00> : vector<1x128xf32>
    %235 = tpu.matmul %233, %234, %cst_237 {dimension_numbers = #tpu.dot_dimension_numbers<[1], [0], [0], [1], [0, 0, 1, 1], [], []>} : vector<1x128xf32>, vector<128x128xf32>, vector<1x128xf32> -> vector<1x128xf32>
    %c0_238 = arith.constant 0 : index
    %c0_239 = arith.constant 0 : index
    %236 = vector.load %arg9[%c0_238, %c0_239] : memref<1x128xf32, #tpu.memory_space<vmem>>, vector<1x128xf32>
    %237 = arith.addf %235, %236 : vector<1x128xf32>
    %cst_240 = arith.constant 0.000000e+00 : f32
    %238 = vector.broadcast %cst_240 : f32 to vector<1x128xf32>
    %239 = arith.maximumf %237, %238 : vector<1x128xf32>
    %c0_241 = arith.constant 0 : index
    %c0_242 = arith.constant 0 : index
    %240 = vector.load %arg10[%c0_241, %c0_242] : memref<128x2xf32, #tpu.memory_space<vmem>>, vector<128x2xf32>
    %cst_243 = arith.constant dense<0.000000e+00> : vector<1x2xf32>
    %241 = tpu.matmul %239, %240, %cst_243 {dimension_numbers = #tpu.dot_dimension_numbers<[1], [0], [0], [1], [0, 0, 1, 1], [], []>} : vector<1x128xf32>, vector<128x2xf32>, vector<1x2xf32> -> vector<1x2xf32>
    %c0_244 = arith.constant 0 : index
    %c0_245 = arith.constant 0 : index
    %242 = vector.load %arg11[%c0_244, %c0_245] : memref<1x2xf32, #tpu.memory_space<vmem>>, vector<1x2xf32>
    %243 = arith.addf %241, %242 : vector<1x2xf32>
    %c0_246 = arith.constant 0 : index
    %c0_247 = arith.constant 0 : index
    %c0_248 = arith.constant 0 : index
    %244 = vector.load %arg12[%c0_246, %c0_247, %c0_248] : memref<1x1x2xf32, #tpu.memory_space<vmem>>, vector<1x1x2xf32>
    %245 = vector.shape_cast %244 : vector<1x1x2xf32> to vector<1x2xf32>
    %246 = vector.shape_cast %243 : vector<1x2xf32> to vector<1x1x2xf32>
    tpu.vector_store %arg12[%c0_246, %c0_247, %c0_248], %246 {strides = array<i32>} : memref<1x1x2xf32, #tpu.memory_space<vmem>>, vector<1x1x2xf32>,
    return
  }
  func.func @transform_0(%arg0: i32) -> (i32, i32, i32, i32) {
    %c0_i32 = arith.constant 0 : i32
    %c0_i32_0 = arith.constant 0 : i32
    %c0_i32_1 = arith.constant 0 : i32
    %c0_i32_2 = arith.constant 0 : i32
    return %c0_i32, %arg0, %c0_i32_0, %c0_i32_1 : i32, i32, i32, i32
  }
  func.func @transform_1(%arg0: i32) -> (i32, i32, i32) {
    %c0_i32 = arith.constant 0 : i32
    %c0_i32_0 = arith.constant 0 : i32
    %c0_i32_1 = arith.constant 0 : i32
    %c0_i32_2 = arith.constant 0 : i32
    return %c0_i32, %c0_i32_0, %c0_i32_1 : i32, i32, i32
  }
  func.func @transform_2(%arg0: i32) -> (i32, i32) {
    %c0_i32 = arith.constant 0 : i32
    %c0_i32_0 = arith.constant 0 : i32
    %c0_i32_1 = arith.constant 0 : i32
    return %c0_i32, %c0_i32_0 : i32, i32
  }
  func.func @transform_3(%arg0: i32) -> (i32, i32, i32) {
    %c0_i32 = arith.constant 0 : i32
    %c0_i32_0 = arith.constant 0 : i32
    %c0_i32_1 = arith.constant 0 : i32
    %c0_i32_2 = arith.constant 0 : i32
    return %c0_i32, %c0_i32_0, %c0_i32_1 : i32, i32, i32
  }
  func.func @transform_4(%arg0: i32) -> (i32, i32) {
    %c0_i32 = arith.constant 0 : i32
    %c0_i32_0 = arith.constant 0 : i32
    %c0_i32_1 = arith.constant 0 : i32
    return %c0_i32, %c0_i32_0 : i32, i32
  }
  func.func @transform_5(%arg0: i32) -> (i32, i32, i32) {
    %c0_i32 = arith.constant 0 : i32
    %c0_i32_0 = arith.constant 0 : i32
    %c0_i32_1 = arith.constant 0 : i32
    %c0_i32_2 = arith.constant 0 : i32
    return %c0_i32, %c0_i32_0, %c0_i32_1 : i32, i32, i32
  }
  func.func @transform_6(%arg0: i32) -> (i32, i32) {
    %c0_i32 = arith.constant 0 : i32
    %c0_i32_0 = arith.constant 0 : i32
    %c0_i32_1 = arith.constant 0 : i32
    return %c0_i32, %c0_i32_0 : i32, i32
  }
  func.func @transform_7(%arg0: i32) -> (i32, i32) {
    %c0_i32 = arith.constant 0 : i32
    %c0_i32_0 = arith.constant 0 : i32
    %c0_i32_1 = arith.constant 0 : i32
    return %c0_i32, %c0_i32_0 : i32, i32
  }
  func.func @transform_8(%arg0: i32) -> (i32, i32) {
    %c0_i32 = arith.constant 0 : i32
    %c0_i32_0 = arith.constant 0 : i32
    %c0_i32_1 = arith.constant 0 : i32
    return %c0_i32, %c0_i32_0 : i32, i32
  }
  func.func @transform_9(%arg0: i32) -> (i32, i32) {
    %c0_i32 = arith.constant 0 : i32
    %c0_i32_0 = arith.constant 0 : i32
    %c0_i32_1 = arith.constant 0 : i32
    return %c0_i32, %c0_i32_0 : i32, i32
  }
  func.func @transform_10(%arg0: i32) -> (i32, i32) {
    %c0_i32 = arith.constant 0 : i32
    %c0_i32_0 = arith.constant 0 : i32
    %c0_i32_1 = arith.constant 0 : i32
    return %c0_i32, %c0_i32_0 : i32, i32
  }
  func.func @transform_11(%arg0: i32) -> (i32, i32, i32) {
    %c0_i32 = arith.constant 0 : i32
    %c0_i32_0 = arith.constant 0 : i32
    %c0_i32_1 = arith.constant 0 : i32
    return %arg0, %c0_i32, %c0_i32_0 : i32, i32, i32
  }
}

</mosaic_0001>

<bundles_post_ra>
// kernel: lenet5_forward.1
= control target key start
LH: loop header
LB: loop body
LE: loop exit
PB: predicated region body
PF: predicated region fallthrough
CT: control target
= control target key end

     0   :  { %s7031_s0 = inlined_call_operand.vmem [shape: f32[4,2,8,96], index: 0, kind: input, shape index: {}]   ;;  %s7032_s1 = inlined_call_operand.vmem [shape: f32[5,96,168], index: 1, kind: input, shape index: {}]   ;;  %s7033_s2 = inlined_call_operand.vmem [shape: f32[1,168], index: 2, kind: input, shape index: {}]   ;;  %s7034_s3 = inlined_call_operand.vmem [shape: f32[5,84,160], index: 3, kind: input, shape index: {}]   ;;  %s7035_s4 = inlined_call_operand.vmem [shape: f32[1,160], index: 4, kind: input, shape index: {}]   ;;  %s7036_s5 = inlined_call_operand.vmem [shape: f32[5,80,128], index: 5, kind: input, shape index: {}]   ;;  %s7037_s6 = inlined_call_operand.vmem [shape: f32[1,128], index: 6, kind: input, shape index: {}]   ;;  %s7038_s7 = inlined_call_operand.vmem [shape: f32[128,128], index: 7, kind: input, shape index: {}]   ;;  %s7039_s8 = inlined_call_operand.vmem [shape: f32[1,128], index: 8, kind: input, shape index: {}]   ;;  %s7040_s9 = inlined_call_operand.vmem [shape: f32[128,2], index: 9, kind: input, shape index: {}]   ;;  %s7041_s10 = inlined_call_operand.vmem [shape: f32[1,2], index: 10, kind: input, shape index: {}]   ;;  %s7042_s11 = inlined_call_operand.hbm [shape: f32[2,1,2], index: 11, kind: output, shape index: {}]  }
   0x1   :  { %7054 = sst [smem:[#allocation10_spill]] %s7031_s0 }
   0x2   :  { %16 = vsyncpa [#allocation4], 0 }
   0x3   :  { %18 = vsyncpa [#allocation4 + $0x1], 0  ;;  %s5274_s17 = smov 0   ;;  %s5276_s18 = smov 0  }
   0x4   :  { %s5278_s19 = smov 0   ;;  %s5280_s20 = smov 0  }
   0x5 LB: > { %s7043_s21 = sadd.s32 4294967295, %s5206_s20   ;;  %s3680_s22 = sadd.s32 4294967294, %s5206_s20   ;;  %s5206_s20 = sphi %s5280_s20, %s7071_s20   ;;  %s5202_s19 = sphi %s5278_s19, %s7070_s19   ;;  %s5198_s18 = sphi %s5276_s18, %s7069_s18   ;;  %s5194_s17 = sphi %s5274_s17, %s7068_s17  }
   0x6   : > { %s5297_s23 = sadd.s32 1, %s5206_s20   ;;  %s31_s24 = sadd.s32 1, %s5202_s19 }
   0x7   : > { %s28_s25 = ssub.s32 %s5206_s20, %s5297_s23  ;;  %p38_p0 = scmp.ne.s32.totalorder %s5202_s19, %s5198_s18 }
   0x8   : > { %p29_p1 = scmp.eq.s32.totalorder %s28_s25, 0  ;;  %p39_p2 = scmp.eq.s32.totalorder %s5206_s20, 0 }
   0x9   : > { %p278_p3 = scmp.eq.s32.totalorder %s7043_s21, 1  ;;  %p283_p4 = scmp.ne.s32.totalorder %s5198_s18, %s5194_s17 }
   0xa   : > { %s5310_s26 = scalar_select %p29_p1, %s5202_s19, %s31_s24  }
   0xb   : > { %p40_p5 = por %p39_p2, %p38_p0  ;;  %p5312_p6 = por %p278_p3, %p38_p0 }
   0xc   : > { %p284_p7 = scmp.eq.s32.totalorder %s3680_s22, 1  ;;  %p3682_p9 = scmp.ge.s32.totalorder %s5206_s20, 2 }
   0xe   : > { %p5316_p8 = por %p284_p7, %p283_p4  ;;  %330 = sbr.rel (%p3682_p9) target bundleno = 33 (0x21), region = 56 }
  0x15   : > { %333 = sbr.rel (!%p40_p5) target bundleno = 33 (0x21), region = 60  ;;  %s335_s29 = sand.u32 (%p40_p5), 1, %s5202_s19  }
  0x16   : > { %s3684_s30 = sshll.u32 (%p40_p5), %s5206_s20, 3  ;;  %s3683_s12 = sshll.u32 (%p40_p5), %s335_s29, 5 }
  0x17   : > { %s7057_s0 = sld [smem:[#allocation10_spill]] (%p40_p5)  ;;  %s337_s16 = scalar_lea.vmem (%p40_p5), [#allocation2], %s3683_s12 }
  0x1d   : > { %s339_s15 = scalar_lea.vmem %s7057_s0, %s3684_s30 }
  0x1e   : > { %v373_v0 = vld [vmem:[%s339_s15] sm:$0xff]  ;;  %v375_v1 = vld [vmem:[%s339_s15 + $0x10] sm:$0xff] }
  0x1f   : > { %v377_v2 = vld [vmem:[%s339_s15 + $0x20] sm:$0xff]  ;;  %374 = vst [vmem:[%s337_s16] sm:$0xff] %v373_v0  ;;  %376 = vst [vmem:[%s337_s16 + $0x8] sm:$0xff] %v375_v1  ;;  %v379_v3 = vld [vmem:[%s339_s15 + $0x30] sm:$0xff] }
  0x20   : > { %378 = vst [vmem:[%s337_s16 + $0x10] sm:$0xff] %v377_v2  ;;  %380 = vst [vmem:[%s337_s16 + $0x18] sm:$0xff] %v379_v3 }
  0x21 PF: > { %p3685_p10 = scmp.ge.s32.totalorder %s5206_s20, 1  ;;  %p385_p11 = scmp.lt.s32.totalorder %s5206_s20, 3 }
  0x23   : > { %p386_p12 = pnand %p3685_p10, %p385_p11 }
  0x25   : > { %389 = sbr.rel (%p386_p12) target bundleno = 1758 (0x6de), region = 98 }
  0x2c   : > { %v3689_v4 = vld [vmem:[%s7032_s1 + $0xc8] sm:$0xff]  ;;  %v3691_v5 = vld [vmem:[%s7032_s1 + $0xd8] sm:$0xff]  ;;  %v3688_v6 = vld [vmem:[%s7032_s1 + $0xc0] sm:$0xff]  ;;  %v7044_v11 = vmov 0.0   ;;  %s5431_s30 = sand.u32 1, %s5198_s18   ;;  %vm482_vm0 = vcmask 785408  }
  0x2d   : > { %v5339_v7 = vpack.c.bf16 %v3691_v5, %v3689_v4  ;;  %v3690_v8 = vld [vmem:[%s7032_s1 + $0xd0] sm:$0xff]  ;;  %v3693_v9 = vld [vmem:[%s7032_s1 + $0xe8] sm:$0xff]  ;;  %v3695_v10 = vld [vmem:[%s7032_s1 + $0xf8] sm:$0xff]  ;;  %550 = vmatprep.mubr.f32.mxu0 %v7044_v11  ;;  %1019 = vmatprep.mubr.f32.mxu1 %v7044_v11  ;;  %s3686_s29 = sshll.u32 %s5431_s30, 5  ;;  %vm2134_vm1 = vcmask 1043456   ;;  %vm2072_vm2 = vcmask 359424  }
  0x2e   : > { %v5352_v12 = vpack.c.bf16 %v3690_v8, %v3688_v6  ;;  %v5354_v13 = vpack.c.bf16 %v3695_v10, %v3693_v9  ;;  %v3692_v14 = vld [vmem:[%s7032_s1 + $0xe0] sm:$0xff]  ;;  %v3694_v15 = vld [vmem:[%s7032_s1 + $0xf0] sm:$0xff]  ;;  %v3697_v16 = vld [vmem:[%s7032_s1 + $0x108] sm:$0xff]  ;;  %s5476_s21 = scalar_lea.vmem [#allocation2], %s3686_s29  ;;  %vm2130_vm3 = vcmask 687104   ;;  %vm5211_vm4 = vmmov 0  }
  0x2f   : > { %4250 = vmatprep.subr.bf16.mxu0 %v5339_v7  ;;  %4370 = vmatprep.subr.bf16.mxu1 %v5339_v7  ;;  %v3699_v17 = vld [vmem:[%s7032_s1 + $0x118] sm:$0xff]  ;;  %v5372_v18 = vpack.c.bf16 %v3694_v15, %v3692_v14  ;;  %v3696_v20 = vld [vmem:[%s7032_s1 + $0x100] sm:$0xff]  ;;  %v3698_v21 = vld [vmem:[%s7032_s1 + $0x110] sm:$0xff]  ;;  %s5212_s24 = smov 48   ;;  %vm2999_vm5 = vcmask 392192   ;;  %vm3026_vm6 = vcmask 654336  }
  0x30   : > { %4252 = vmatpush1.bf16.msra.mxu0 %v5352_v12  ;;  %4372 = vmatpush1.bf16.msra.mxu1 %v5352_v12  ;;  %v5376_v19 = vpack.c.bf16 %v3699_v17, %v3697_v16  ;;  %v3701_v22 = vld [vmem:[%s7032_s1 + $0x128] sm:$0xff]  ;;  %v3703_v23 = vld [vmem:[%s7032_s1 + $0x138] sm:$0xff]  ;;  %v5392_v24 = vpack.c.bf16 %v3698_v21, %v3696_v20  ;;  %v3700_v26 = vld [vmem:[%s7032_s1 + $0x120] sm:$0xff]  ;;  %s7067_s25 = sadd.s32 4294967295, %s5206_s20   ;;  %s429_s13 = scalar_lea.vmem [#allocation3], %s5431_s30  ;;  %vm3604_vm7 = vcmask 8192  }
  0x31   : > { %4254 = vmatprep.subr.bf16.mxu0 %v5354_v13  ;;  %4374 = vmatprep.subr.bf16.mxu1 %v5354_v13  ;;  %v5396_v25 = vpack.c.bf16 %v3703_v23, %v3701_v22  ;;  %v3702_v27 = vld [vmem:[%s7032_s1 + $0x130] sm:$0xff]  ;;  %v3705_v28 = vld [vmem:[%s7032_s1 + $0x148] sm:$0xff]  ;;  %v3707_v29 = vld [vmem:[%s7032_s1 + $0x158] sm:$0xff]  ;;  %s3972_s12 = sshll.u32 %s7067_s25, 4  ;;  %s3619_s29 = sshll.u32 %s429_s13, 4  ;;  %s6989_s29 = int_to_ptr.vmem [resolvable:$true] %s3619_s29 }
  0x32   : > { %v5412_v30 = vpack.c.bf16 %v3702_v27, %v3700_v26  ;;  %v5416_v31 = vpack.c.bf16 %v3707_v29, %v3705_v28  ;;  %v3704_v32 = vld [vmem:[%s7032_s1 + $0x140] sm:$0xff]  ;;  %v3706_v33 = vld [vmem:[%s7032_s1 + $0x150] sm:$0xff]  ;;  %v3709_v34 = vld [vmem:[%s7032_s1 + $0x168] sm:$0xff]  ;;  %s3607_s16 = scalar_lea.sflag [#allocation4], %s5431_s30  ;;  %s5144_s22 = scalar_lea.vmem %s6989_s29, 16 }
  0x33   : > { %v3711_v35 = vld [vmem:[%s7032_s1 + $0x178] sm:$0xff]  ;;  %v5435_v36 = vpack.c.bf16 %v3706_v33, %v3704_v32  ;;  %v3708_v38 = vld [vmem:[%s7032_s1 + $0x160] sm:$0xff]  ;;  %v3710_v39 = vld [vmem:[%s7032_s1 + $0x170] sm:$0xff]  ;;  %p5145_p13 = scmp.ne.s32.totalorder %s6989_s29, %s5144_s22 }
  0x34   : > { %4256 = vmatpush1.bf16.msra.mxu0 %v5372_v18  ;;  %4376 = vmatpush1.bf16.msra.mxu1 %v5372_v18  ;;  %v5439_v37 = vpack.c.bf16 %v3711_v35, %v3709_v34  ;;  %v432_v40 = vld [vmem:[%s7032_s1 + $0x8] sm:$0xff]  ;;  %v434_v41 = vld [vmem:[%s7032_s1 + $0x18] sm:$0xff]  ;;  %v5456_v42 = vpack.c.bf16 %v3710_v39, %v3708_v38  ;;  %v431_v44 = vld [vmem:[%s7032_s1] sm:$0xff] }
  0x35   : > { %4258 = vmatprep.subr.bf16.mxu0 %v5376_v19  ;;  %4378 = vmatprep.subr.bf16.mxu1 %v5376_v19  ;;  %v5460_v43 = vpack.c.bf16 %v434_v41, %v432_v40  ;;  %v433_v45 = vld [vmem:[%s7032_s1 + $0x10] sm:$0xff]  ;;  %v436_v46 = vld [vmem:[%s7032_s1 + $0x28] sm:$0xff]  ;;  %v438_v47 = vld [vmem:[%s7032_s1 + $0x38] sm:$0xff]  ;;  %p5146_p0 = pnand %p5145_p13, %p5312_p6 }
  0x36   : > { %v5479_v48 = vld [vmem:[%s5476_s21 + $0x8] sm:$0x7f]  ;;  %v5481_v49 = vpack.c.bf16 %v433_v45, %v431_v44  ;;  %v5484_v50 = vld [vmem:[%s5476_s21 + $0x10] sm:$0x7f]  ;;  %v5488_v51 = vpack.c.bf16 %v438_v47, %v436_v46  ;;  %v435_v52 = vld [vmem:[%s7032_s1 + $0x20] sm:$0xff] }
  0x37   : > { %v437_v53 = vld [vmem:[%s7032_s1 + $0x30] sm:$0xff]  ;;  %v440_v54 = vld [vmem:[%s7032_s1 + $0x48] sm:$0xff]  ;;  %v442_v55 = vld [vmem:[%s7032_s1 + $0x58] sm:$0xff]  ;;  %p5147_p1 = pneg %p5146_p0 }
  0x38   : > { %4260 = vmatpush1.bf16.msra.mxu0 %v5392_v24  ;;  %4380 = vmatpush1.bf16.msra.mxu1 %v5392_v24  ;;  %v5508_v56 = vpack.c.bf16 %v437_v53, %v435_v52  ;;  %v5512_v57 = vpack.c.bf16 %v442_v55, %v440_v54  ;;  %v439_v58 = vld [vmem:[%s7032_s1 + $0x40] sm:$0xff]  ;;  %v441_v59 = vld [vmem:[%s7032_s1 + $0x50] sm:$0xff]  ;;  %v444_v60 = vld [vmem:[%s7032_s1 + $0x68] sm:$0xff] }
  0x39   : > { %4262 = vmatprep.subr.bf16.mxu0 %v5396_v25  ;;  %4382 = vmatprep.subr.bf16.mxu1 %v5396_v25  ;;  %v446_v61 = vld [vmem:[%s7032_s1 + $0x78] sm:$0xff]  ;;  %v5530_v62 = vpack.c.bf16 %v441_v59, %v439_v58  ;;  %v443_v0 = vld [vmem:[%s7032_s1 + $0x60] sm:$0xff]  ;;  %v445_v1 = vld [vmem:[%s7032_s1 + $0x70] sm:$0xff] }
  0x3a   : > { %v5534_v63 = vpack.c.bf16 %v446_v61, %v444_v60  ;;  %v448_v2 = vld [vmem:[%s7032_s1 + $0x88] sm:$0xff]  ;;  %v450_v3 = vld [vmem:[%s7032_s1 + $0x98] sm:$0xff]  ;;  %v5550_v4 = vpack.c.bf16 %v445_v1, %v443_v0  ;;  %v447_v6 = vld [vmem:[%s7032_s1 + $0x80] sm:$0xff] }
  0x3b   : > { %v5554_v5 = vpack.c.bf16 %v450_v3, %v448_v2  ;;  %v449_v8 = vld [vmem:[%s7032_s1 + $0x90] sm:$0xff]  ;;  %v452_v9 = vld [vmem:[%s7032_s1 + $0xa8] sm:$0xff]  ;;  %v454_v10 = vld [vmem:[%s7032_s1 + $0xb8] sm:$0xff] }
  0x3c   : > { %4264 = vmatpush1.bf16.msra.mxu0 %v5412_v30  ;;  %4384 = vmatpush1.bf16.msra.mxu1 %v5412_v30  ;;  %v5570_v14 = vpack.c.bf16 %v449_v8, %v447_v6  ;;  %v5574_v15 = vpack.c.bf16 %v454_v10, %v452_v9  ;;  %v451_v16 = vld [vmem:[%s7032_s1 + $0xa0] sm:$0xff]  ;;  %v453_v17 = vld [vmem:[%s7032_s1 + $0xb0] sm:$0xff]  ;;  %v3716_v20 = vld [vmem:[%s7032_s1 + $0x188] sm:$0xff] }
  0x3d   : > { %4266 = vmatprep.subr.bf16.mxu0 %v5416_v31  ;;  %4386 = vmatprep.subr.bf16.mxu1 %v5416_v31  ;;  %v3718_v21 = vld [vmem:[%s7032_s1 + $0x198] sm:$0xff]  ;;  %v5590_v22 = vpack.c.bf16 %v453_v17, %v451_v16  ;;  %v3715_v26 = vld [vmem:[%s7032_s1 + $0x180] sm:$0xff]  ;;  %v3717_v27 = vld [vmem:[%s7032_s1 + $0x190] sm:$0xff] }
  0x3e   : > { %v5594_v23 = vpack.c.bf16 %v3718_v21, %v3716_v20  ;;  %v3720_v28 = vld [vmem:[%s7032_s1 + $0x1a8] sm:$0xff]  ;;  %v3722_v29 = vld [vmem:[%s7032_s1 + $0x1b8] sm:$0xff]  ;;  %v430_v32 = vld [vmem:[%s5476_s21] sm:$0x7f]  ;;  %v5611_v33 = vpack.c.bf16 %v3717_v27, %v3715_v26 }
  0x3f   : > { %v5615_v34 = vpack.c.bf16 %v3722_v29, %v3720_v28  ;;  %v3719_v35 = vld [vmem:[%s7032_s1 + $0x1a0] sm:$0xff]  ;;  %v3721_v38 = vld [vmem:[%s7032_s1 + $0x1b0] sm:$0xff]  ;;  %v3724_v39 = vld [vmem:[%s7032_s1 + $0x1c8] sm:$0xff] }
  0x40   : > { %4268 = vmatpush1.bf16.msra.mxu0 %v5435_v36  ;;  %4388 = vmatpush1.bf16.msra.mxu1 %v5435_v36  ;;  %v3726_v40 = vld [vmem:[%s7032_s1 + $0x1d8] sm:$0xff]  ;;  %v5634_v41 = vpack.c.bf16 %v3721_v38, %v3719_v35  ;;  %v3723_v45 = vld [vmem:[%s7032_s1 + $0x1c0] sm:$0xff]  ;;  %v3725_v46 = vld [vmem:[%s7032_s1 + $0x1d0] sm:$0xff] }
  0x41   : > { %4270 = vmatprep.subr.bf16.mxu0 %v5439_v37  ;;  %4390 = vmatprep.subr.bf16.mxu1 %v5439_v37  ;;  %v5638_v44 = vpack.c.bf16 %v3726_v40, %v3724_v39  ;;  %v3728_v47 = vld [vmem:[%s7032_s1 + $0x1e8] sm:$0xff]  ;;  %v5656_v52 = vpack.c.bf16 %v3725_v46, %v3723_v45  ;;  %v3727_v54 = vld [vmem:[%s7032_s1 + $0x1e0] sm:$0xff]  ;;  %v3729_v55 = vld [vmem:[%s7032_s1 + $0x1f0] sm:$0xff] }
  0x42   : > { %v3732_v58 = vld [vmem:[%s7032_s1 + $0x208] sm:$0xff]  ;;  %v3734_v59 = vld [vmem:[%s7032_s1 + $0x218] sm:$0xff]  ;;  %v5676_v60 = vpack.c.bf16 %v3729_v55, %v3727_v54  ;;  %v3731_v0 = vld [vmem:[%s7032_s1 + $0x200] sm:$0xff] }
  0x43   : > { %v5680_v61 = vpack.c.bf16 %v3734_v59, %v3732_v58  ;;  %v3733_v1 = vld [vmem:[%s7032_s1 + $0x210] sm:$0xff]  ;;  %v3736_v2 = vld [vmem:[%s7032_s1 + $0x228] sm:$0xff]  ;;  %v3738_v3 = vld [vmem:[%s7032_s1 + $0x238] sm:$0xff] }
  0x44   : > { %4272 = vmatpush1.bf16.msra.mxu0 %v5456_v42  ;;  %4392 = vmatpush1.bf16.msra.mxu1 %v5456_v42  ;;  %v5696_v6 = vpack.c.bf16 %v3733_v1, %v3731_v0  ;;  %v5700_v8 = vpack.c.bf16 %v3738_v3, %v3736_v2  ;;  %v3735_v9 = vld [vmem:[%s7032_s1 + $0x220] sm:$0xff]  ;;  %v3737_v10 = vld [vmem:[%s7032_s1 + $0x230] sm:$0xff]  ;;  %v3742_v16 = vld [vmem:[%s7032_s1 + $0x248] sm:$0xff] }
  0x45   : > { %4274 = vmatprep.subr.bf16.mxu0 %v5460_v43  ;;  %4394 = vmatprep.subr.bf16.mxu1 %v5460_v43  ;;  %v3744_v17 = vld [vmem:[%s7032_s1 + $0x258] sm:$0xff]  ;;  %v5716_v20 = vpack.c.bf16 %v3737_v10, %v3735_v9  ;;  %v3741_v26 = vld [vmem:[%s7032_s1 + $0x240] sm:$0xff]  ;;  %v3743_v27 = vld [vmem:[%s7032_s1 + $0x250] sm:$0xff] }
  0x46   : > { %v5720_v21 = vpack.c.bf16 %v3744_v17, %v3742_v16  ;;  %v3746_v28 = vld [vmem:[%s7032_s1 + $0x268] sm:$0xff]  ;;  %v3748_v29 = vld [vmem:[%s7032_s1 + $0x278] sm:$0xff]  ;;  %v3745_v39 = vld [vmem:[%s7032_s1 + $0x260] sm:$0xff] }
  0x47   : > { %3712 = vmatmul.mubr.msk.f32.vlgmr.msra.gmra.mrb[0].mxu0 %vm482_vm0, %v5479_v48  ;;  %3791 = vmatmul.mubr.msk.f32.vlgmr.msra.gmra.mrb[0].mxu1 %vm482_vm0, %v5484_v50  ;;  %v5739_v35 = vld [vmem:[%s5476_s21 + $0x18] sm:$0x7f]  ;;  %v5743_v38 = vpack.c.bf16 %v3748_v29, %v3746_v28  ;;  %v3747_v40 = vld [vmem:[%s7032_s1 + $0x270] sm:$0xff]  ;;  %v3750_v45 = vld [vmem:[%s7032_s1 + $0x288] sm:$0xff] }
  0x48   : > { %4276 = vmatpush1.bf16.msra.mxu0 %v5481_v49  ;;  %4396 = vmatpush1.bf16.msra.mxu1 %v5481_v49  ;;  %v3752_v46 = vld [vmem:[%s7032_s1 + $0x298] sm:$0xff]  ;;  %v3749_v54 = vld [vmem:[%s7032_s1 + $0x280] sm:$0xff]  ;;  %v3751_v55 = vld [vmem:[%s7032_s1 + $0x290] sm:$0xff] }
  0x49   : > { %4278 = vmatprep.subr.bf16.mxu0 %v5488_v51  ;;  %4398 = vmatprep.subr.bf16.mxu1 %v5488_v51  ;;  %v3754_v58 = vld [vmem:[%s7032_s1 + $0x2a8] sm:$0xff]  ;;  %v3756_v59 = vld [vmem:[%s7032_s1 + $0x2b8] sm:$0xff]  ;;  %v5785_v0 = vpack.c.bf16 %v3751_v55, %v3749_v54  ;;  %v3753_v2 = vld [vmem:[%s7032_s1 + $0x2a0] sm:$0xff] }
  0x4a   : > { %624 = vmatprep.mubr.f32.mxu0 %v7044_v11  ;;  %1090 = vmatprep.mubr.f32.mxu1 %v7044_v11  ;;  %v5789_v1 = vpack.c.bf16 %v3756_v59, %v3754_v58  ;;  %v3755_v3 = vld [vmem:[%s7032_s1 + $0x2b0] sm:$0xff]  ;;  %v3758_v9 = vld [vmem:[%s7032_s1 + $0x2c8] sm:$0xff]  ;;  %v3760_v10 = vld [vmem:[%s7032_s1 + $0x2d8] sm:$0xff] }
  0x4b   : > { %v5805_v16 = vpack.c.bf16 %v3755_v3, %v3753_v2  ;;  %v5809_v17 = vpack.c.bf16 %v3760_v10, %v3758_v9  ;;  %v3762_v28 = vld [vmem:[%s7032_s1 + $0x2e8] sm:$0xff]  ;;  %v3764_v29 = vld [vmem:[%s7032_s1 + $0x2f8] sm:$0xff]  ;;  %v3766_v2 = vld [vmem:[%s7032_s1 + $0x300] sm:$0xff] }
  0x4c   : > { %4280 = vmatpush1.bf16.msra.mxu0 %v5508_v56  ;;  %4400 = vmatpush1.bf16.msra.mxu1 %v5508_v56  ;;  %v3767_v54 = vld [vmem:[%s7032_s1 + $0x308] sm:$0xff]  ;;  %v3769_v55 = vld [vmem:[%s7032_s1 + $0x318] sm:$0xff]  ;;  %v3768_v3 = vld [vmem:[%s7032_s1 + $0x310] sm:$0xff] }
  0x4d   : > { %4282 = vmatprep.subr.bf16.mxu0 %v5512_v57  ;;  %4402 = vmatprep.subr.bf16.mxu1 %v5512_v57  ;;  %v5849_v59 = vpack.c.bf16 %v3769_v55, %v3767_v54  ;;  %v3771_v9 = vld [vmem:[%s7032_s1 + $0x328] sm:$0xff]  ;;  %v3773_v10 = vld [vmem:[%s7032_s1 + $0x338] sm:$0xff] }
  0x4e   : > { %v3777_v54 = vld [vmem:[%s7032_s1 + $0x358] sm:$0xff] }
  0x50   : > { %4284 = vmatpush1.bf16.msra.mxu0 %v5530_v62  ;;  %4404 = vmatpush1.bf16.msra.mxu1 %v5530_v62 }
  0x51   : > { %4286 = vmatprep.subr.bf16.mxu0 %v5534_v63  ;;  %4406 = vmatprep.subr.bf16.mxu1 %v5534_v63 }
  0x54   : > { %4288 = vmatpush1.bf16.msra.mxu0 %v5550_v4  ;;  %4408 = vmatpush1.bf16.msra.mxu1 %v5550_v4 }
  0x55   : > { %4290 = vmatprep.subr.bf16.mxu0 %v5554_v5  ;;  %4410 = vmatprep.subr.bf16.mxu1 %v5554_v5 }
  0x58   : > { %4292 = vmatpush1.bf16.msra.mxu0 %v5570_v14  ;;  %4412 = vmatpush1.bf16.msra.mxu1 %v5570_v14 }
  0x59   : > { %4294 = vmatprep.subr.bf16.mxu0 %v5574_v15  ;;  %4414 = vmatprep.subr.bf16.mxu1 %v5574_v15 }
  0x5c   : > { %4296 = vmatpush1.bf16.msra.mxu0 %v5590_v22  ;;  %4416 = vmatpush1.bf16.msra.mxu1 %v5590_v22 }
  0x5d   : > { %4298 = vmatprep.subr.bf16.mxu0 %v5594_v23  ;;  %4418 = vmatprep.subr.bf16.mxu1 %v5594_v23 }
  0x5f   : > { %3713 = vmatmul.mubr.msk.f32.vlgmr.msra.gmra.mrb[0].mxu0 %vm482_vm0, %v430_v32  ;;  %3792 = vmatmul.mubr.msk.f32.vlgmr.msra.gmra.mrb[0].mxu1 %vm482_vm0, %v5479_v48  ;;  %v3730_v48 = vld [vmem:[%s7032_s1 + $0x1f8] sm:$0xff]  ;;  %v5736_v32 = vpack.c.bf16 %v3743_v27, %v3741_v26  ;;  %v3757_v26 = vld [vmem:[%s7032_s1 + $0x2c0] sm:$0xff]  ;;  %v3759_v27 = vld [vmem:[%s7032_s1 + $0x2d0] sm:$0xff] }
  0x60   : > { %4300 = vmatpush1.bf16.msra.mxu0 %v5611_v33  ;;  %4420 = vmatpush1.bf16.msra.mxu1 %v5611_v33  ;;  %v5660_v53 = vpack.c.bf16 %v3730_v48, %v3728_v47  ;;  %v5763_v47 = vpack.c.bf16 %v3747_v40, %v3745_v39  ;;  %v5767_v48 = vpack.c.bf16 %v3752_v46, %v3750_v45  ;;  %v3761_v45 = vld [vmem:[%s7032_s1 + $0x2e0] sm:$0xff]  ;;  %v3763_v46 = vld [vmem:[%s7032_s1 + $0x2f0] sm:$0xff] }
  0x61   : > { %4302 = vmatprep.subr.bf16.mxu0 %v5615_v34  ;;  %4422 = vmatprep.subr.bf16.mxu1 %v5615_v34  ;;  %v5825_v39 = vpack.c.bf16 %v3759_v27, %v3757_v26  ;;  %v5829_v40 = vpack.c.bf16 %v3764_v29, %v3762_v28  ;;  %v5845_v58 = vpack.c.bf16 %v3763_v46, %v3761_v45  ;;  %v5868_v27 = vld [vmem:[%s5476_s21 + $0x1] sm:$0x7f]  ;;  %v3772_v45 = vld [vmem:[%s7032_s1 + $0x330] sm:$0xff]  ;;  %v3775_v46 = vld [vmem:[%s7032_s1 + $0x348] sm:$0xff] }
  0x62   : > { %725 = vmatprep.mubr.f32.mxu0 %v7044_v11  ;;  %1161 = vmatprep.mubr.f32.mxu1 %v7044_v11  ;;  %v5865_v26 = vpack.c.bf16 %v3768_v3, %v3766_v2  ;;  %v5872_v28 = vpack.c.bf16 %v3773_v10, %v3771_v9  ;;  %v3770_v29 = vld [vmem:[%s7032_s1 + $0x320] sm:$0xff]  ;;  %v5896_v2 = vpack.c.bf16 %v3777_v54, %v3775_v46  ;;  %v3776_v9 = vld [vmem:[%s7032_s1 + $0x350] sm:$0xff]  ;;  %v3779_v10 = vld [vmem:[%s7032_s1 + $0x368] sm:$0xff] }
  0x63   : > { %v5892_v55 = vpack.c.bf16 %v3772_v45, %v3770_v29  ;;  %v3774_v3 = vld [vmem:[%s7032_s1 + $0x340] sm:$0xff]  ;;  %v3781_v29 = vld [vmem:[%s7032_s1 + $0x378] sm:$0xff] }
  0x64   : > { %4304 = vmatpush1.bf16.msra.mxu0 %v5634_v41  ;;  %4424 = vmatpush1.bf16.msra.mxu1 %v5634_v41  ;;  %7059 = vst [vmem:[#allocation7_spill] sm:$0xff] %v5896_v2  ;;  %v5914_v45 = vpack.c.bf16 %v3776_v9, %v3774_v3  ;;  %v5918_v46 = vpack.c.bf16 %v3781_v29, %v3779_v10  ;;  %v3778_v54 = vld [vmem:[%s7032_s1 + $0x360] sm:$0xff]  ;;  %v3785_v3 = vld [vmem:[%s7032_s1 + $0x398] sm:$0xff] }
  0x65   : > { %4306 = vmatprep.subr.bf16.mxu0 %v5638_v44  ;;  %4426 = vmatprep.subr.bf16.mxu1 %v5638_v44  ;;  %7058 = vst [vmem:[#allocation6_spill] sm:$0xff] %v5892_v55  ;;  %v3782_v29 = vld [vmem:[%s7032_s1 + $0x380] sm:$0xff] }
  0x66   : > { %7060 = vst [vmem:[#allocation8_spill] sm:$0xff] %v5914_v45  ;;  %7061 = vst [vmem:[#allocation9_spill] sm:$0xff] %v5918_v46 }
  0x68   : > { %4308 = vmatpush1.bf16.msra.mxu0 %v5656_v52  ;;  %4428 = vmatpush1.bf16.msra.mxu1 %v5656_v52 }
  0x69   : > { %4310 = vmatprep.subr.bf16.mxu0 %v5660_v53  ;;  %4430 = vmatprep.subr.bf16.mxu1 %v5660_v53 }
  0x6c   : > { %4312 = vmatpush1.bf16.msra.mxu0 %v5676_v60  ;;  %4432 = vmatpush1.bf16.msra.mxu1 %v5676_v60 }
  0x6d   : > { %4314 = vmatprep.subr.bf16.mxu0 %v5680_v61  ;;  %4434 = vmatprep.subr.bf16.mxu1 %v5680_v61 }
  0x70   : > { %4316 = vmatpush1.bf16.msra.mxu0 %v5696_v6  ;;  %4436 = vmatpush1.bf16.msra.mxu1 %v5696_v6 }
  0x71   : > { %4318 = vmatprep.subr.bf16.mxu0 %v5700_v8  ;;  %4438 = vmatprep.subr.bf16.mxu1 %v5700_v8 }
  0x74   : > { %4320 = vmatpush1.bf16.msra.mxu0 %v5716_v20  ;;  %4440 = vmatpush1.bf16.msra.mxu1 %v5716_v20 }
  0x75   : > { %4322 = vmatprep.subr.bf16.mxu0 %v5720_v21  ;;  %4442 = vmatprep.subr.bf16.mxu1 %v5720_v21 }
  0x77   : > { %3739 = vmatmul.mubr.msk.f32.vlgmr.msra.gmra.mrb[0].mxu0 %vm482_vm0, %v5484_v50  ;;  %3793 = vmatmul.mubr.msk.f32.vlgmr.msra.gmra.mrb[0].mxu1 %vm482_vm0, %v5739_v35 }
  0x78   : > { %4324 = vmatpush1.bf16.msra.mxu0 %v5736_v32  ;;  %4444 = vmatpush1.bf16.msra.mxu1 %v5736_v32 }
  0x79   : > { %4326 = vmatprep.subr.bf16.mxu0 %v5743_v38  ;;  %4446 = vmatprep.subr.bf16.mxu1 %v5743_v38 }
  0x7a   : > { %828 = vmatprep.mubr.f32.mxu0 %v7044_v11  ;;  %1234 = vmatprep.mubr.f32.mxu1 %v7044_v11 }
  0x7c   : > { %4328 = vmatpush1.bf16.msra.mxu0 %v5763_v47  ;;  %4448 = vmatpush1.bf16.msra.mxu1 %v5763_v47 }
  0x7d   : > { %4330 = vmatprep.subr.bf16.mxu0 %v5767_v48  ;;  %4450 = vmatprep.subr.bf16.mxu1 %v5767_v48 }
  0x80   : > { %4332 = vmatpush1.bf16.msra.mxu0 %v5785_v0  ;;  %4452 = vmatpush1.bf16.msra.mxu1 %v5785_v0 }
  0x81   : > { %4334 = vmatprep.subr.bf16.mxu0 %v5789_v1  ;;  %4454 = vmatprep.subr.bf16.mxu1 %v5789_v1 }
  0x84   : > { %4336 = vmatpush1.bf16.msra.mxu0 %v5805_v16  ;;  %4456 = vmatpush1.bf16.msra.mxu1 %v5805_v16 }
  0x85   : > { %4338 = vmatprep.subr.bf16.mxu0 %v5809_v17  ;;  %4458 = vmatprep.subr.bf16.mxu1 %v5809_v17 }
  0x88   : > { %4340 = vmatpush1.bf16.msra.mxu0 %v5825_v39  ;;  %4460 = vmatpush1.bf16.msra.mxu1 %v5825_v39 }
  0x89   : > { %4342 = vmatprep.subr.bf16.mxu0 %v5829_v40  ;;  %4462 = vmatprep.subr.bf16.mxu1 %v5829_v40 }
  0x8c   : > { %4344 = vmatpush1.bf16.msra.mxu0 %v5845_v58  ;;  %4464 = vmatpush1.bf16.msra.mxu1 %v5845_v58 }
  0x8d   : > { %4346 = vmatprep.subr.bf16.mxu0 %v5849_v59  ;;  %4466 = vmatprep.subr.bf16.mxu1 %v5849_v59 }
  0x8f   : > { %3765 = vmatmul.mubr.msk.f32.vlgmr.msra.gmra.mrb[0].mxu0 %vm482_vm0, %v5739_v35  ;;  %3794 = vmatmul.mubr.msk.f32.vlgmr.msra.gmra.mrb[0].mxu1 %vm482_vm0, %v5868_v27 }
  0x90   : > { %4348 = vmatpush1.bf16.msra.mxu0 %v5865_v26  ;;  %4468 = vmatpush1.bf16.msra.mxu1 %v5865_v26 }
  0x91   : > { %4350 = vmatprep.subr.bf16.mxu0 %v5872_v28  ;;  %4470 = vmatprep.subr.bf16.mxu1 %v5872_v28 }
  0x92   : > { %930 = vmatprep.mubr.f32.mxu0 %v7044_v11  ;;  %1311 = vmatprep.mubr.f32.mxu1 %v7044_v11  ;;  %v3780_v11 = vld [vmem:[%s7032_s1 + $0x370] sm:$0xff] }
  0x93   : > { %v5934_v9 = vpack.c.bf16 %v3780_v11, %v3778_v54  ;;  %v3789_v11 = vld [vmem:[%s7032_s1 + $0x3b8] sm:$0xff] }
  0x94   : > { %4352 = vmatpush1.bf16.msra.mxu0 %v5892_v55  ;;  %4472 = vmatpush1.bf16.msra.mxu1 %v5892_v55  ;;  %v3783_v55 = vld [vmem:[%s7032_s1 + $0x388] sm:$0xff] }
  0x95   : > { %4354 = vmatprep.subr.bf16.mxu0 %v5896_v2  ;;  %4474 = vmatprep.subr.bf16.mxu1 %v5896_v2  ;;  %v5938_v10 = vpack.c.bf16 %v3785_v3, %v3783_v55  ;;  %v3784_v2 = vld [vmem:[%s7032_s1 + $0x390] sm:$0xff]  ;;  %v3786_v3 = vld [vmem:[%s7032_s1 + $0x3a0] sm:$0xff] }
  0x96   : > { %v5954_v55 = vpack.c.bf16 %v3784_v2, %v3782_v29  ;;  %v2088_v29 = vld [vmem:[%s7034_s3 + $0x18] sm:$0xff] }
  0x98   : > { %4356 = vmatpush1.bf16.msra.mxu0 %v5914_v45  ;;  %4476 = vmatpush1.bf16.msra.mxu1 %v5914_v45  ;;  %v3787_v45 = vld [vmem:[%s7032_s1 + $0x3a8] sm:$0xff] }
  0x99   : > { %4358 = vmatprep.subr.bf16.mxu0 %v5918_v46  ;;  %4478 = vmatprep.subr.bf16.mxu1 %v5918_v46  ;;  %v5958_v54 = vpack.c.bf16 %v3789_v11, %v3787_v45  ;;  %v3788_v46 = vld [vmem:[%s7032_s1 + $0x3b0] sm:$0xff]  ;;  %v5975_v45 = vld [vmem:[%s5476_s21 + $0x9] sm:$0x7f] }
  0x9a   : > { %v5968_v2 = vpack.c.bf16 %v3788_v46, %v3786_v3  ;;  %v7062_v46 = vmov 0.0  }
  0x9c   : > { %4360 = vmatpush1.bf16.msra.mxu0 %v5934_v9  ;;  %4480 = vmatpush1.bf16.msra.mxu1 %v5934_v9 }
  0x9d   : > { %4362 = vmatprep.subr.bf16.mxu0 %v5938_v10  ;;  %4482 = vmatprep.subr.bf16.mxu1 %v5938_v10 }
  0xa0   : > { %4364 = vmatpush1.bf16.msra.mxu0 %v5954_v55  ;;  %4484 = vmatpush1.bf16.msra.mxu1 %v5954_v55 }
  0xa1   : > { %4366 = vmatprep.subr.bf16.mxu0 %v5958_v54  ;;  %4486 = vmatprep.subr.bf16.mxu1 %v5958_v54 }
  0xa4   : > { %4368 = vmatpush1.bf16.msra.mxu0 %v5968_v2  ;;  %4488 = vmatpush1.bf16.msra.mxu1 %v5968_v2 }
  0xa5   : > { %4490 = vmatprep.subr.bf16.mxu0 %v5339_v7  ;;  %4610 = vmatprep.subr.bf16.mxu1 %v5339_v7  ;;  %v3801_v7 = vld [vmem:[%s5476_s21 + $0x11] sm:$0x7f] }
  0xa7   : > { %3790 = vmatmul.mubr.msk.f32.vlgmr.msra.gmra.mrb[0].mxu0 %vm482_vm0, %v5868_v27  ;;  %3796 = vmatmul.mubr.msk.f32.vlgmr.msra.gmra.mrb[0].mxu1 %vm482_vm0, %v5975_v45 }
  0xa8   : > { %4492 = vmatpush1.bf16.msra.mxu0 %v5352_v12  ;;  %4612 = vmatpush1.bf16.msra.mxu1 %v5352_v12  ;;  %v7063_v12 = vld [vmem:[#allocation6_spill] sm:$0xff] }
  0xa9   : > { %4494 = vmatprep.subr.bf16.mxu0 %v5354_v13  ;;  %4614 = vmatprep.subr.bf16.mxu1 %v5354_v13  ;;  %v7064_v13 = vld [vmem:[#allocation7_spill] sm:$0xff] }
  0xaa   : > { %1390 = vmatprep.mubr.f32.mxu0 %v7062_v46  ;;  %1759 = vmatprep.mubr.f32.mxu1 %v7062_v46 }
  0xac   : > { %4496 = vmatpush1.bf16.msra.mxu0 %v5372_v18  ;;  %4616 = vmatpush1.bf16.msra.mxu1 %v5372_v18  ;;  %v7065_v18 = vld [vmem:[#allocation8_spill] sm:$0xff] }
  0xad   : > { %4498 = vmatprep.subr.bf16.mxu0 %v5376_v19  ;;  %4618 = vmatprep.subr.bf16.mxu1 %v5376_v19  ;;  %v7066_v19 = vld [vmem:[#allocation9_spill] sm:$0xff] }
  0xb0   : > { %4500 = vmatpush1.bf16.msra.mxu0 %v5392_v24  ;;  %4620 = vmatpush1.bf16.msra.mxu1 %v5392_v24  ;;  %v3810_v24 = vld [vmem:[%s7034_s3 + $0xb8] sm:$0xff] }
  0xb1   : > { %4502 = vmatprep.subr.bf16.mxu0 %v5396_v25  ;;  %4622 = vmatprep.subr.bf16.mxu1 %v5396_v25  ;;  %v3812_v25 = vld [vmem:[%s7034_s3 + $0xc8] sm:$0xff] }
  0xb4   : > { %4504 = vmatpush1.bf16.msra.mxu0 %v5412_v30  ;;  %4624 = vmatpush1.bf16.msra.mxu1 %v5412_v30  ;;  %v4729_v30 = vpack.c.bf16 %v3812_v25, %v3810_v24 }
  0xb5   : > { %4506 = vmatprep.subr.bf16.mxu0 %v5416_v31  ;;  %4626 = vmatprep.subr.bf16.mxu1 %v5416_v31  ;;  %v3809_v31 = vld [vmem:[%s7034_s3 + $0xb0] sm:$0xff] }
  0xb8   : > { %4508 = vmatpush1.bf16.msra.mxu0 %v5435_v36  ;;  %4628 = vmatpush1.bf16.msra.mxu1 %v5435_v36  ;;  %v3811_v36 = vld [vmem:[%s7034_s3 + $0xc0] sm:$0xff] }
  0xb9   : > { %4510 = vmatprep.subr.bf16.mxu0 %v5439_v37  ;;  %4630 = vmatprep.subr.bf16.mxu1 %v5439_v37  ;;  %v3814_v37 = vld [vmem:[%s7034_s3 + $0xd8] sm:$0xff] }
  0xbc   : > { %4512 = vmatpush1.bf16.msra.mxu0 %v5456_v42  ;;  %4632 = vmatpush1.bf16.msra.mxu1 %v5456_v42  ;;  %v3816_v42 = vld [vmem:[%s7034_s3 + $0xe8] sm:$0xff] }
  0xbd   : > { %4514 = vmatprep.subr.bf16.mxu0 %v5460_v43  ;;  %4634 = vmatprep.subr.bf16.mxu1 %v5460_v43  ;;  %v3807_v43 = vld [vmem:[%s5476_s21 + $0x19] sm:$0x7f]  ;;  %s5209_s21 = smov 44  }
  0xbf   : > { %3797 = vmatmul.mubr.msk.f32.vlgmr.msra.gmra.mrb[2].mxu0 %vm482_vm0, %v5739_v35  ;;  %3803 = vmatmul.mubr.msk.f32.vlgmr.msra.gmra.mrb[2].mxu1 %vm482_vm0, %v5868_v27 }
  0xc0   : > { %4516 = vmatpush1.bf16.msra.mxu0 %v5481_v49  ;;  %4636 = vmatpush1.bf16.msra.mxu1 %v5481_v49  ;;  %v4731_v49 = vpack.c.bf16 %v3811_v36, %v3809_v31 }
  0xc1   : > { %4518 = vmatprep.subr.bf16.mxu0 %v5488_v51  ;;  %4638 = vmatprep.subr.bf16.mxu1 %v5488_v51  ;;  %v3813_v51 = vld [vmem:[%s7034_s3 + $0xd0] sm:$0xff] }
  0xc2   : > { %1461 = vmatprep.mubr.f32.mxu0 %v7062_v46  ;;  %1830 = vmatprep.mubr.f32.mxu1 %v7062_v46 }
  0xc4   : > { %4520 = vmatpush1.bf16.msra.mxu0 %v5508_v56  ;;  %4640 = vmatpush1.bf16.msra.mxu1 %v5508_v56  ;;  %v3815_v56 = vld [vmem:[%s7034_s3 + $0xe0] sm:$0xff] }
  0xc5   : > { %4522 = vmatprep.subr.bf16.mxu0 %v5512_v57  ;;  %4642 = vmatprep.subr.bf16.mxu1 %v5512_v57  ;;  %v3818_v57 = vld [vmem:[%s7034_s3 + $0xf8] sm:$0xff] }
  0xc8   : > { %4524 = vmatpush1.bf16.msra.mxu0 %v5530_v62  ;;  %4644 = vmatpush1.bf16.msra.mxu1 %v5530_v62  ;;  %v3820_v62 = vld [vmem:[%s7034_s3 + $0x108] sm:$0xff] }
  0xc9   : > { %4526 = vmatprep.subr.bf16.mxu0 %v5534_v63  ;;  %4646 = vmatprep.subr.bf16.mxu1 %v5534_v63  ;;  %v4735_v63 = vpack.c.bf16 %v3815_v56, %v3813_v51  ;;  %v2087_v51 = vld [vmem:[%s7034_s3 + $0x10] sm:$0xff] }
  0xcc   : > { %4528 = vmatpush1.bf16.msra.mxu0 %v5550_v4  ;;  %4648 = vmatpush1.bf16.msra.mxu1 %v5550_v4  ;;  %v4737_v4 = vpack.c.bf16 %v3820_v62, %v3818_v57  ;;  %v2090_v57 = vld [vmem:[%s7034_s3 + $0x28] sm:$0xff]  ;;  %v2092_v62 = vld [vmem:[%s7034_s3 + $0x38] sm:$0xff] }
  0xcd   : > { %4530 = vmatprep.subr.bf16.mxu0 %v5554_v5  ;;  %4650 = vmatprep.subr.bf16.mxu1 %v5554_v5  ;;  %v3817_v5 = vld [vmem:[%s7034_s3 + $0xf0] sm:$0xff] }
  0xd0   : > { %4532 = vmatpush1.bf16.msra.mxu0 %v5570_v14  ;;  %4652 = vmatpush1.bf16.msra.mxu1 %v5570_v14  ;;  %v3819_v14 = vld [vmem:[%s7034_s3 + $0x100] sm:$0xff] }
  0xd1   : > { %4534 = vmatprep.subr.bf16.mxu0 %v5574_v15  ;;  %4654 = vmatprep.subr.bf16.mxu1 %v5574_v15  ;;  %v4739_v15 = vpack.c.bf16 %v3819_v14, %v3817_v5 }
  0xd4   : > { %4536 = vmatpush1.bf16.msra.mxu0 %v5590_v22  ;;  %4656 = vmatpush1.bf16.msra.mxu1 %v5590_v22  ;;  %v941_v22 = vlaneseq }
  0xd5   : > { %4538 = vmatprep.subr.bf16.mxu0 %v5594_v23  ;;  %4658 = vmatprep.subr.bf16.mxu1 %v5594_v23 }
  0xd6   : > { %v6168_v23 = vshrl.u32 %v941_v22, 7  ;;  %v2089_v22 = vld [vmem:[%s7034_s3 + $0x20] sm:$0xff] }
  0xd7   : > { %3798 = vmatmul.mubr.msk.f32.vlgmr.msra.gmra.mrb[2].mxu0 %vm482_vm0, %v5484_v50  ;;  %3804 = vmatmul.mubr.msk.f32.vlgmr.msra.gmra.mrb[2].mxu1 %vm482_vm0, %v5739_v35  ;;  %v4733_v50 = vpack.c.bf16 %v3816_v42, %v3814_v37  ;;  %v3827_v35 = vld [vmem:[%s7034_s3 + $0x140] sm:$0xff] }
  0xd8   : > { %4540 = vmatpush1.bf16.msra.mxu0 %v5611_v33  ;;  %4660 = vmatpush1.bf16.msra.mxu1 %v5611_v33  ;;  %v3822_v33 = vld [vmem:[%s7034_s3 + $0x118] sm:$0xff] }
  0xd9   : > { %4542 = vmatprep.subr.bf16.mxu0 %v5615_v34  ;;  %4662 = vmatprep.subr.bf16.mxu1 %v5615_v34  ;;  %v3824_v34 = vld [vmem:[%s7034_s3 + $0x128] sm:$0xff] }
  0xda   : > { %1532 = vmatprep.mubr.f32.mxu0 %v7062_v46  ;;  %1901 = vmatprep.mubr.f32.mxu1 %v7062_v46 }
  0xdc   : > { %4544 = vmatpush1.bf16.msra.mxu0 %v5634_v41  ;;  %4664 = vmatpush1.bf16.msra.mxu1 %v5634_v41  ;;  %v4741_v41 = vpack.c.bf16 %v3824_v34, %v3822_v33  ;;  %v2091_v33 = vld [vmem:[%s7034_s3 + $0x30] sm:$0xff]  ;;  %v2094_v34 = vld [vmem:[%s7034_s3 + $0x48] sm:$0xff] }
  0xdd   : > { %4546 = vmatprep.subr.bf16.mxu0 %v5638_v44  ;;  %4666 = vmatprep.subr.bf16.mxu1 %v5638_v44  ;;  %v3821_v44 = vld [vmem:[%s7034_s3 + $0x110] sm:$0xff] }
  0xe0   : > { %4548 = vmatpush1.bf16.msra.mxu0 %v5656_v52  ;;  %4668 = vmatpush1.bf16.msra.mxu1 %v5656_v52  ;;  %v3823_v52 = vld [vmem:[%s7034_s3 + $0x120] sm:$0xff] }
  0xe1   : > { %4550 = vmatprep.subr.bf16.mxu0 %v5660_v53  ;;  %4670 = vmatprep.subr.bf16.mxu1 %v5660_v53  ;;  %v943_v53 = vsub.s32 0, %v6168_v23 }
  0xe4   : > { %4552 = vmatpush1.bf16.msra.mxu0 %v5676_v60  ;;  %4672 = vmatpush1.bf16.msra.mxu1 %v5676_v60  ;;  %v4743_v60 = vpack.c.bf16 %v3823_v52, %v3821_v44  ;;  %v4755_v44 = vpack.c.bf16 %v2091_v33, %v2089_v22  ;;  %v3863_v22 = vld [vmem:[%s7034_s3 + $0x218] sm:$0xff]  ;;  %v3865_v33 = vld [vmem:[%s7034_s3 + $0x228] sm:$0xff] }
  0xe5   : > { %4554 = vmatprep.subr.bf16.mxu0 %v5680_v61  ;;  %4674 = vmatprep.subr.bf16.mxu1 %v5680_v61  ;;  %v939_v61 = vld [vmem:[%s7033_s2] sm:$0x3] }
  0xe8   : > { %4556 = vmatpush1.bf16.msra.mxu0 %v5696_v6  ;;  %4676 = vmatpush1.bf16.msra.mxu1 %v5696_v6  ;;  %v947_v6 = vsub.s32 1, %v6168_v23 }
  0xe9   : > { %4558 = vmatprep.subr.bf16.mxu0 %v5700_v8  ;;  %4678 = vmatprep.subr.bf16.mxu1 %v5700_v8  ;;  %v3826_v8 = vld [vmem:[%s7034_s3 + $0x138] sm:$0xff] }
  0xec   : > { %4560 = vmatpush1.bf16.msra.mxu0 %v5716_v20  ;;  %4680 = vmatpush1.bf16.msra.mxu1 %v5716_v20  ;;  %v3828_v20 = vld [vmem:[%s7034_s3 + $0x148] sm:$0xff] }
  0xed   : > { %4562 = vmatprep.subr.bf16.mxu0 %v5720_v21  ;;  %4682 = vmatprep.subr.bf16.mxu1 %v5720_v21  ;;  %v4745_v21 = vpack.c.bf16 %v3828_v20, %v3826_v8  ;;  %v2098_v8 = vld [vmem:[%s7034_s3 + $0x68] sm:$0xff]  ;;  %v2100_v20 = vld [vmem:[%s7034_s3 + $0x78] sm:$0xff] }
  0xef   : > { %3799 = vmatmul.mubr.msk.f32.vlgmr.msra.gmra.mrb[2].mxu0 %vm482_vm0, %v5868_v27  ;;  %3805 = vmatmul.mubr.msk.f32.vlgmr.msra.gmra.mrb[2].mxu1 %vm482_vm0, %v5975_v45  ;;  %v3829_v27 = vld [vmem:[%s7034_s3 + $0x150] sm:$0xf] }
  0xf0   : > { %4564 = vmatpush1.bf16.msra.mxu0 %v5736_v32  ;;  %4684 = vmatpush1.bf16.msra.mxu1 %v5736_v32  ;;  %v3825_v32 = vld [vmem:[%s7034_s3 + $0x130] sm:$0xff] }
  0xf1   : > { %4566 = vmatprep.subr.bf16.mxu0 %v5743_v38  ;;  %4686 = vmatprep.subr.bf16.mxu1 %v5743_v38  ;;  %v944_v38 = vrot.slane %v939_v61, %v943_v53 }
  0xf2   : > { %1605 = vmatprep.mubr.f32.mxu0 %v7062_v46  ;;  %1974 = vmatprep.mubr.f32.mxu1 %v7062_v46 }
  0xf4   : > { %4568 = vmatpush1.bf16.msra.mxu0 %v5763_v47  ;;  %4688 = vmatpush1.bf16.msra.mxu1 %v5763_v47  ;;  %v4747_v47 = vpack.c.bf16 %v3827_v35, %v3825_v32  ;;  %v6267_v32 = vpack.c.bf16 %v2100_v20, %v2098_v8  ;;  %v2097_v35 = vld [vmem:[%s7034_s3 + $0x60] sm:$0xff] }
  0xf5   : > { %4570 = vmatprep.subr.bf16.mxu0 %v5767_v48  ;;  %4690 = vmatprep.subr.bf16.mxu1 %v5767_v48  ;;  %v948_v48 = vrot.slane %v939_v61, %v947_v6  ;;  %v2095_v61 = vld [vmem:[%s7034_s3 + $0x50] sm:$0xff] }
  0xf8   : > { %4572 = vmatpush1.bf16.msra.mxu0 %v5785_v0  ;;  %4692 = vmatpush1.bf16.msra.mxu1 %v5785_v0 }
  0xf9   : > { %4574 = vmatprep.subr.bf16.mxu0 %v5789_v1  ;;  %4694 = vmatprep.subr.bf16.mxu1 %v5789_v1 }
  0xfc   : > { %4576 = vmatpush1.bf16.msra.mxu0 %v5805_v16  ;;  %4696 = vmatpush1.bf16.msra.mxu1 %v5805_v16 }
  0xfd   : > { %4578 = vmatprep.subr.bf16.mxu0 %v5809_v17  ;;  %4698 = vmatprep.subr.bf16.mxu1 %v5809_v17 }
 0x100   : > { %4580 = vmatpush1.bf16.msra.mxu0 %v5825_v39  ;;  %4700 = vmatpush1.bf16.msra.mxu1 %v5825_v39 }
 0x101   : > { %4582 = vmatprep.subr.bf16.mxu0 %v5829_v40  ;;  %4702 = vmatprep.subr.bf16.mxu1 %v5829_v40 }
 0x104   : > { %4584 = vmatpush1.bf16.msra.mxu0 %v5845_v58  ;;  %4704 = vmatpush1.bf16.msra.mxu1 %v5845_v58  ;;  %v3830_v58 = vld [vmem:[%s7034_s3 + $0x158] sm:$0xf] }
 0x105   : > { %4586 = vmatprep.subr.bf16.mxu0 %v5849_v59  ;;  %4706 = vmatprep.subr.bf16.mxu1 %v5849_v59 }
 0x107   : > { %3800 = vmatmul.mubr.msk.f32.vlgmr.msra.gmra.mrb[2].mxu0 %vm482_vm0, %v5975_v45  ;;  %3806 = vmatmul.mubr.msk.f32.vlgmr.msra.gmra.mrb[2].mxu1 %vm482_vm0, %v3801_v7 }
 0x108   : > { %4588 = vmatpush1.bf16.msra.mxu0 %v5865_v26  ;;  %4708 = vmatpush1.bf16.msra.mxu1 %v5865_v26 }
 0x109   : > { %4590 = vmatprep.subr.bf16.mxu0 %v5872_v28  ;;  %4710 = vmatprep.subr.bf16.mxu1 %v5872_v28 }
 0x10a   : > { %1682 = vmatprep.mubr.f32.mxu0 %v7062_v46  ;;  %2051 = vmatprep.mubr.f32.mxu1 %v7062_v46 }
 0x10c   : > { %4592 = vmatpush1.bf16.msra.mxu0 %v7063_v12  ;;  %4712 = vmatpush1.bf16.msra.mxu1 %v7063_v12 }
 0x10d   : > { %4594 = vmatprep.subr.bf16.mxu0 %v7064_v13  ;;  %4714 = vmatprep.subr.bf16.mxu1 %v7064_v13 }
 0x110   : > { %4596 = vmatpush1.bf16.msra.mxu0 %v7065_v18  ;;  %4716 = vmatpush1.bf16.msra.mxu1 %v7065_v18 }
 0x111   : > { %4598 = vmatprep.subr.bf16.mxu0 %v7066_v19  ;;  %4718 = vmatprep.subr.bf16.mxu1 %v7066_v19 }
 0x114   : > { %4600 = vmatpush1.bf16.msra.mxu0 %v5934_v9  ;;  %4720 = vmatpush1.bf16.msra.mxu1 %v5934_v9 }
 0x115   : > { %4602 = vmatprep.subr.bf16.mxu0 %v5938_v10  ;;  %4722 = vmatprep.subr.bf16.mxu1 %v5938_v10  ;;  %v2086_v10 = vld [vmem:[%s7034_s3 + $0x8] sm:$0xff] }
 0x118   : > { %4604 = vmatpush1.bf16.msra.mxu0 %v5954_v55  ;;  %4724 = vmatpush1.bf16.msra.mxu1 %v5954_v55 }
 0x119   : > { %4606 = vmatprep.subr.bf16.mxu0 %v5958_v54  ;;  %4726 = vmatprep.subr.bf16.mxu1 %v5958_v54  ;;  %v4749_v54 = vpack.c.bf16 %v2088_v29, %v2086_v10  ;;  %v3839_v10 = vld [vmem:[%s7034_s3 + $0x170] sm:$0xff]  ;;  %v3842_v29 = vld [vmem:[%s7034_s3 + $0x188] sm:$0xff] }
 0x11c   : > { %4608 = vmatpush1.bf16.msra.mxu0 %v5968_v2  ;;  %4728 = vmatpush1.bf16.msra.mxu1 %v5968_v2 }
 0x11d   : > { %4830 = vmatprep.subr.bf16.mxu1 %v4729_v30  ;;  %4730 = vmatprep.subr.bf16.mxu0 %v4729_v30 }
 0x11f   : > { %3802 = vmatmul.mubr.msk.f32.vlgmr.msra.gmra.mrb[2].mxu0 %vm482_vm0, %v3801_v7  ;;  %3808 = vmatmul.mubr.msk.f32.vlgmr.msra.gmra.mrb[2].mxu1 %vm482_vm0, %v3807_v43 }
 0x120   : > { %4832 = vmatpush1.bf16.msra.mxu1 %v4731_v49  ;;  %2687 = vmatprep.mubr.f32.mxu1 %v7062_v46 }
 0x121   : > { %4834 = vmatprep.subr.bf16.mxu1 %v4733_v50  ;;  %4732 = vmatpush1.bf16.msra.mxu0 %v4731_v49 }
 0x122   : > { %4734 = vmatprep.subr.bf16.mxu0 %v4733_v50  ;;  %2205 = vmatprep.mubr.f32.mxu0 %v7062_v46  ;;  %v2085_v50 = vld [vmem:[%s7034_s3] sm:$0xff] }
 0x123   : > { %v4751_v5 = vpack.c.bf16 %v2087_v51, %v2085_v50  ;;  %v3854_v50 = vld [vmem:[%s7034_s3 + $0x1e8] sm:$0xff]  ;;  %v3856_v51 = vld [vmem:[%s7034_s3 + $0x1f8] sm:$0xff] }
 0x124   : > { %4836 = vmatpush1.bf16.msra.mxu1 %v4735_v63 }
 0x125   : > { %4838 = vmatprep.subr.bf16.mxu1 %v4737_v4  ;;  %4736 = vmatpush1.bf16.msra.mxu0 %v4735_v63 }
 0x126   : > { %4738 = vmatprep.subr.bf16.mxu0 %v4737_v4 }
 0x128   : > { %4840 = vmatpush1.bf16.msra.mxu1 %v4739_v15 }
 0x129   : > { %4740 = vmatpush1.bf16.msra.mxu0 %v4739_v15  ;;  %4842 = vmatprep.subr.bf16.mxu1 %v4741_v41  ;;  %v4753_v15 = vpack.c.bf16 %v2092_v62, %v2090_v57  ;;  %v6395_v57 = vpack.c.bf16 %v3856_v51, %v3854_v50  ;;  %v3853_v62 = vld [vmem:[%s7034_s3 + $0x1e0] sm:$0xff]  ;;  %v3897_v51 = vld [vmem:[%s7034_s3 + $0x310] sm:$0xff] }
 0x12a   : > { %4742 = vmatprep.subr.bf16.mxu0 %v4741_v41  ;;  %v2096_v41 = vld [vmem:[%s7034_s3 + $0x58] sm:$0xff]  ;;  %v3895_v50 = vld [vmem:[%s7034_s3 + $0x300] sm:$0xff] }
 0x12b   : > { %v4757_v52 = vpack.c.bf16 %v2096_v41, %v2094_v34  ;;  %v3862_v34 = vld [vmem:[%s7034_s3 + $0x210] sm:$0xff]  ;;  %v3864_v41 = vld [vmem:[%s7034_s3 + $0x220] sm:$0xff] }
 0x12c   : > { %4844 = vmatpush1.bf16.msra.mxu1 %v4743_v60  ;;  %v6444_v8 = vpack.c.bf16 %v3864_v41, %v3862_v34 }
 0x12d   : > { %4744 = vmatpush1.bf16.msra.mxu0 %v4743_v60  ;;  %4846 = vmatprep.subr.bf16.mxu1 %v4745_v21  ;;  %v2093_v60 = vld [vmem:[%s7034_s3 + $0x40] sm:$0xff] }
 0x12e   : > { %4746 = vmatprep.subr.bf16.mxu0 %v4745_v21  ;;  %v4759_v21 = vpack.c.bf16 %v2095_v61, %v2093_v60  ;;  %v3869_v60 = vld [vmem:[%s7034_s3 + $0x248] sm:$0xff]  ;;  %v6442_v61 = vpack.c.bf16 %v3865_v33, %v3863_v22  ;;  %v3906_v33 = vld [vmem:[%s7034_s3 + $0x358] sm:$0xff] }
 0x12f   : > { %v3904_v22 = vld [vmem:[%s7034_s3 + $0x348] sm:$0xff] }
 0x130   : > { %4848 = vmatpush1.bf16.msra.mxu1 %v4747_v47  ;;  %v4825_v41 = vpack.c.bf16 %v3906_v33, %v3904_v22  ;;  %v3940_v22 = vld [vmem:[%s7036_s5 + $0xa8] sm:$0xff] }
 0x131   : > { %4748 = vmatpush1.bf16.msra.mxu0 %v4747_v47  ;;  %3912 = vmatprep.subr.msk.mxu1 %vm2134_vm1, %v3830_v58  ;;  %v2102_v47 = vld [vmem:[%s7034_s3 + $0x88] sm:$0xff] }
 0x132   : > { %3831 = vmatprep.subr.msk.mxu0 %vm2134_vm1, %v3830_v58  ;;  %v3838_v58 = vld [vmem:[%s7034_s3 + $0x168] sm:$0xff] }
 0x134   : > { %3913 = vmatpush1.msk.msra.mxu1 %vm2134_vm1, %v3829_v27 }
 0x135   : > { %3832 = vmatpush1.msk.msra.mxu0 %vm2134_vm1, %v3829_v27  ;;  %4850 = vmatprep.subr.bf16.mxu1 %v4749_v54 }
 0x136   : > { %4750 = vmatprep.subr.bf16.mxu0 %v4749_v54 }
 0x17a   : > { %v932_v0 = vpop.f32.mrb[0].mxu0  ;;  %v1313_v1 = vpop.f32.mrb[0].mxu1 }
 0x17b   : > { %v951_v16 = vadd.f32 %v944_v38, %v932_v0  ;;  %v1320_v17 = vadd.f32 %v1313_v1, %v944_v38  ;;  %v934_v39 = vpop.f32.mrb[1].mxu0  ;;  %v1315_v40 = vpop.f32.mrb[1].mxu1 }
 0x17c   : > { %v952_v59 = vadd.f32 %v948_v48, %v934_v39  ;;  %v1321_v26 = vadd.f32 %v1315_v40, %v948_v48  ;;  %v6296_v40 = vld [vmem:[%s7034_s3 + $0xa8] sm:$0xf] }
 0x17d   : > { %v953_v28 = vmax.f32 %v951_v16, 0.0  ;;  %v1322_v9 = vmax.f32 %v1320_v17, 0.0  ;;  %v2101_v16 = vld [vmem:[%s7034_s3 + $0x80] sm:$0xff]  ;;  %v2103_v17 = vld [vmem:[%s7034_s3 + $0x90] sm:$0xff] }
 0x17e   : > { %v954_v11 = vmax.f32 %v952_v59, 0.0  ;;  %v1323_v55 = vmax.f32 %v1321_v26, 0.0  ;;  %v6290_v39 = vpack.c.bf16 %v2103_v17, %v2101_v16  ;;  %v3840_v59 = vld [vmem:[%s7034_s3 + $0x178] sm:$0xff]  ;;  %v6310_v26 = vld [vmem:[%s7034_s3 + $0xa0] sm:$0xf] }
 0x17f   : > { %v1324_v3 = vmax.f32 %v953_v28, %v1322_v9  ;;  %v6312_v27 = vpack.c.bf16 %v3840_v59, %v3838_v58  ;;  %v3837_v9 = vld [vmem:[%s7034_s3 + $0x160] sm:$0xff]  ;;  %v3875_v17 = vld [vmem:[%s7034_s3 + $0x278] sm:$0xff]  ;;  %v3874_v59 = vld [vmem:[%s7034_s3 + $0x270] sm:$0xff] }
 0x180   : > { %v1325_v2 = vmax.f32 %v954_v11, %v1323_v55  ;;  %v3844_v11 = vld [vmem:[%s7034_s3 + $0x198] sm:$0xff]  ;;  %v3872_v16 = vld [vmem:[%s7034_s3 + $0x260] sm:$0xff] }
 0x181   : > { %2068 = vrot.lane.b32.xlu0 %v1324_v3, %s5209_s21 }
 0x185   : > { %2070 = vrot.lane.b32.xlu0 %v1325_v2, %s5209_s21 }
 0x1f2   : > { %v1684_v45 = vpop.f32.mrb[2].mxu0  ;;  %v2053_v7 = vpop.f32.mrb[2].mxu1 }
 0x1f3   : > { %v1691_v12 = vadd.f32 %v1684_v45, %v944_v38  ;;  %v2060_v13 = vadd.f32 %v2053_v7, %v944_v38  ;;  %v2055_v18 = vpop.f32.mrb[3].mxu1  ;;  %v2069_v19 = vpop.permute.xlu0 %2068  ;;  %v2099_v38 = vld [vmem:[%s7034_s3 + $0x70] sm:$0xff]  ;;  %v6334_v45 = vpack.c.bf16 %v3844_v11, %v3842_v29  ;;  %v3841_v7 = vld [vmem:[%s7034_s3 + $0x180] sm:$0xff] }
 0x1f4   : > { %v2061_v24 = vadd.f32 %v2055_v18, %v948_v48  ;;  %v1686_v25 = vpop.f32.mrb[3].mxu0  ;;  %v4763_v0 = vpack.c.bf16 %v2099_v38, %v2097_v35  ;;  %v3848_v18 = vld [vmem:[%s7034_s3 + $0x1b8] sm:$0xff]  ;;  %v3868_v35 = vld [vmem:[%s7034_s3 + $0x240] sm:$0xff]  ;;  %v3878_v29 = vld [vmem:[%s7034_s3 + $0x290] sm:$0xff] }
 0x1f5   : > { %v1693_v30 = vmax.f32 %v1691_v12, 0.0  ;;  %v2062_v31 = vmax.f32 %v2060_v13, 0.0  ;;  %v1692_v36 = vadd.f32 %v1686_v25, %v948_v48  ;;  %v2104_v48 = vld [vmem:[%s7034_s3 + $0x98] sm:$0xff]  ;;  %v3843_v12 = vld [vmem:[%s7034_s3 + $0x190] sm:$0xff]  ;;  %v3846_v13 = vld [vmem:[%s7034_s3 + $0x1a8] sm:$0xff] }
 0x1f6   : > { %v2063_v37 = vmax.f32 %v2061_v24, 0.0  ;;  %v6282_v1 = vpack.c.bf16 %v2104_v48, %v2102_v47  ;;  %v6356_v24 = vpack.c.bf16 %v3848_v18, %v3846_v13  ;;  %v3845_v25 = vld [vmem:[%s7034_s3 + $0x1a0] sm:$0xff]  ;;  %v3871_v38 = vld [vmem:[%s7034_s3 + $0x258] sm:$0xff]  ;;  %v3873_v47 = vld [vmem:[%s7034_s3 + $0x268] sm:$0xff] }
 0x1f7   : > { %v1694_v42 = vmax.f32 %v1692_v36, 0.0  ;;  %v2071_v43 = vpop.permute.xlu0 %2070  ;;  %v2064_v49 = vmax.f32 %v1693_v30, %v2062_v31  ;;  %v3847_v30 = vld [vmem:[%s7034_s3 + $0x1b0] sm:$0xff]  ;;  %v3850_v31 = vld [vmem:[%s7034_s3 + $0x1c8] sm:$0xff]  ;;  %v3852_v36 = vld [vmem:[%s7034_s3 + $0x1d8] sm:$0xff] }
 0x1f8   : > { %v2073_v56 = vsel %vm2072_vm2, %v2069_v19, %v2071_v43  ;;  %v6353_v19 = vpack.c.bf16 %v3843_v12, %v3841_v7  ;;  %v3849_v43 = vld [vmem:[%s7034_s3 + $0x1c0] sm:$0xff]  ;;  %v3889_v12 = vld [vmem:[%s7034_s3 + $0x2d0] sm:$0xff]  ;;  %v3892_v18 = vld [vmem:[%s7034_s3 + $0x2e8] sm:$0xff] }
 0x1f9   : > { %v2065_v63 = vmax.f32 %v1694_v42, %v2063_v37  ;;  %v6234_v4 = vmax.f32 %v1324_v3, %v2073_v56  ;;  %2078 = vrot.lane.b32.xlu1 %v2064_v49, %s5209_s21  ;;  %v6330_v3 = vpack.c.bf16 %v3839_v10, %v3837_v9  ;;  %v6373_v37 = vpack.c.bf16 %v3847_v30, %v3845_v25  ;;  %v3880_v11 = vld [vmem:[%s7034_s3 + $0x2a0] sm:$0xff]  ;;  %v3882_v13 = vld [vmem:[%s7034_s3 + $0x2b0] sm:$0xf] }
 0x1fa   : > { %v6376_v42 = vpack.c.bf16 %v3852_v36, %v3850_v31  ;;  %v3887_v7 = vld [vmem:[%s7034_s3 + $0x2c0] sm:$0xff] }
 0x1fb   : > { %v2315_v14 = vrot.slane %v6234_v4, 1  ;;  %v4811_v25 = vpack.c.bf16 %v3889_v12, %v3887_v7  ;;  %v2525_v30 = vrot.slane %v6234_v4, 2  ;;  %v3891_v36 = vld [vmem:[%s7034_s3 + $0x2e0] sm:$0xff] }
 0x1fc   : > { %v2607_v7 = vld [vmem:[%s7035_s4] sm:$0x3] }
 0x1fd   : > { %2080 = vrot.lane.b32.xlu1 %v2065_v63, %s5209_s21  ;;  %3914 = vmatmul.mubr.msk.f32.vlgmr.msra.gmra.mrb[4].mxu1 %vm2130_vm3, %v2315_v14  ;;  %v3855_v63 = vld [vmem:[%s7034_s3 + $0x1f0] sm:$0xff]  ;;  %v3011_v12 = vld [vmem:[%s7036_s5 + $0x40] sm:$0xff]  ;;  %s6987_s21 = scalar_lea.hbm %s7042_s11, %s3972_s12 }
 0x1fe   : > { %4852 = vmatpush1.bf16.msra.mxu1 %v4751_v5  ;;  %2758 = vmatprep.mubr.f32.mxu1 %v7062_v46 }
 0x1ff   : > { %4854 = vmatprep.subr.bf16.mxu1 %v4753_v15 }
 0x202   : > { %4856 = vmatpush1.bf16.msra.mxu1 %v4755_v44 }
 0x203   : > { %4858 = vmatprep.subr.bf16.mxu1 %v4757_v52 }
 0x206   : > { %4860 = vmatpush1.bf16.msra.mxu1 %v4759_v21 }
 0x207   : > { %4862 = vmatprep.subr.bf16.mxu1 %v6267_v32 }
 0x20a   : > { %4864 = vmatpush1.bf16.msra.mxu1 %v4763_v0 }
 0x20b   : > { %4866 = vmatprep.subr.bf16.mxu1 %v6282_v1 }
 0x20e   : > { %4868 = vmatpush1.bf16.msra.mxu1 %v6290_v39 }
 0x20f   : > { %3915 = vmatprep.subr.msk.mxu1 %vm2134_vm1, %v6296_v40 }
 0x212   : > { %3916 = vmatpush1.msk.msra.mxu1 %vm2134_vm1, %v6310_v26 }
 0x213   : > { %4870 = vmatprep.subr.bf16.mxu1 %v6312_v27 }
 0x26b   : > { %v2079_v28 = vpop.permute.xlu1 %2078 }
 0x26f   : > { %v2081_v55 = vpop.permute.xlu1 %2080 }
 0x270   : > { %v2082_v54 = vsel %vm2072_vm2, %v2079_v28, %v2081_v55  ;;  %v3881_v28 = vld [vmem:[%s7034_s3 + $0x2a8] sm:$0xff]  ;;  %v6530_v55 = vpack.c.bf16 %v3880_v11, %v3878_v29  ;;  %v3933_v29 = vld [vmem:[%s7036_s5 + $0x80] sm:$0xff] }
 0x271   : > { %v6332_v2 = vmax.f32 %v2064_v49, %v2082_v54  ;;  %v3851_v49 = vld [vmem:[%s7034_s3 + $0x1d0] sm:$0xff]  ;;  %v6537_v54 = vld [vmem:[%s7034_s3 + $0x2b8] sm:$0xf]  ;;  %v3934_v11 = vld [vmem:[%s7036_s5 + $0x88] sm:$0xff] }
 0x272   : > { %v6391_v56 = vpack.c.bf16 %v3851_v49, %v3849_v43  ;;  %v3898_v43 = vld [vmem:[%s7034_s3 + $0x318] sm:$0xff] }
 0x273   : > { %3833 = vmatmul.mubr.msk.f32.vlgmr.msra.gmra.mrb[4].mxu0 %vm2130_vm3, %v6332_v2  ;;  %3917 = vmatmul.mubr.msk.f32.vlgmr.msra.gmra.mrb[4].mxu1 %vm2130_vm3, %v6332_v2  ;;  %v2420_v20 = vrot.slane %v6332_v2, 1 }
 0x274   : > { %4752 = vmatpush1.bf16.msra.mxu0 %v4751_v5  ;;  %4872 = vmatpush1.bf16.msra.mxu1 %v6330_v3  ;;  %v6404_v5 = vpack.c.bf16 %v3855_v63, %v3853_v62  ;;  %v4819_v62 = vpack.c.bf16 %v3897_v51, %v3895_v50 }
 0x275   : > { %4754 = vmatprep.subr.bf16.mxu0 %v4753_v15  ;;  %4874 = vmatprep.subr.bf16.mxu1 %v6334_v45  ;;  %v6411_v15 = vld [vmem:[%s7034_s3 + $0x208] sm:$0xf] }
 0x276   : > { %2285 = vmatprep.mubr.f32.mxu0 %v7062_v46  ;;  %2829 = vmatprep.mubr.f32.mxu1 %v7062_v46 }
 0x278   : > { %4756 = vmatpush1.bf16.msra.mxu0 %v4755_v44  ;;  %4876 = vmatpush1.bf16.msra.mxu1 %v6353_v19  ;;  %v6434_v44 = vld [vmem:[%s7034_s3 + $0x200] sm:$0xf] }
 0x279   : > { %4758 = vmatprep.subr.bf16.mxu0 %v4757_v52  ;;  %4878 = vmatprep.subr.bf16.mxu1 %v6356_v24  ;;  %v3867_v52 = vld [vmem:[%s7034_s3 + $0x238] sm:$0xff] }
 0x27c   : > { %4760 = vmatpush1.bf16.msra.mxu0 %v4759_v21  ;;  %4880 = vmatpush1.bf16.msra.mxu1 %v6373_v37  ;;  %v6451_v21 = vpack.c.bf16 %v3869_v60, %v3867_v52  ;;  %v3905_v52 = vld [vmem:[%s7034_s3 + $0x350] sm:$0xff] }
 0x27d   : > { %4762 = vmatprep.subr.bf16.mxu0 %v6267_v32  ;;  %4882 = vmatprep.subr.bf16.mxu1 %v6376_v42  ;;  %v3866_v32 = vld [vmem:[%s7034_s3 + $0x230] sm:$0xff] }
 0x27e   : > { %v6474_v48 = vpack.c.bf16 %v3868_v35, %v3866_v32  ;;  %v3927_v32 = vld [vmem:[%s7036_s5 + $0x50] sm:$0xff]  ;;  %v5210_v35 = vmov 0.0|0.0  }
 0x280   : > { %4764 = vmatpush1.bf16.msra.mxu0 %v4763_v0  ;;  %4884 = vmatpush1.bf16.msra.mxu1 %v6391_v56  ;;  %v6478_v0 = vpack.c.bf16 %v3873_v47, %v3871_v38  ;;  %v3005_v47 = vld [vmem:[%s7036_s5 + $0x10] sm:$0xff] }
 0x281   : > { %4766 = vmatprep.subr.bf16.mxu0 %v6282_v1  ;;  %4886 = vmatprep.subr.bf16.mxu1 %v6395_v57  ;;  %v3870_v1 = vld [vmem:[%s7034_s3 + $0x250] sm:$0xff] }
 0x284   : > { %4768 = vmatpush1.bf16.msra.mxu0 %v6290_v39  ;;  %4888 = vmatpush1.bf16.msra.mxu1 %v6404_v5  ;;  %v3877_v39 = vld [vmem:[%s7034_s3 + $0x288] sm:$0xff] }
 0x285   : > { %3834 = vmatprep.subr.msk.mxu0 %vm2134_vm1, %v6296_v40  ;;  %3918 = vmatprep.subr.msk.mxu1 %vm2134_vm1, %v6411_v15  ;;  %v6496_v40 = vpack.c.bf16 %v3872_v16, %v3870_v1  ;;  %v6500_v58 = vpack.c.bf16 %v3877_v39, %v3875_v17  ;;  %v3929_v1 = vld [vmem:[%s7036_s5 + $0x60] sm:$0xff]  ;;  %v3930_v16 = vld [vmem:[%s7036_s5 + $0x68] sm:$0xff] }
 0x286   : > { %v4933_v39 = vpack.c.bf16 %v3930_v16, %v3929_v1  ;;  %v3957_v1 = vld [vmem:[%s7036_s5 + $0x128] sm:$0xff] }
 0x288   : > { %3835 = vmatpush1.msk.msra.mxu0 %vm2134_vm1, %v6310_v26  ;;  %3919 = vmatpush1.msk.msra.mxu1 %vm2134_vm1, %v6434_v44  ;;  %v3876_v26 = vld [vmem:[%s7034_s3 + $0x280] sm:$0xff] }
 0x289   : > { %3836 = vmatmul.mubr.msk.f32.vlgmr.msra.gmra.mrb[4].mxu0 %vm2130_vm3, %v6234_v4  ;;  %4770 = vmatprep.subr.bf16.mxu0 %v6312_v27  ;;  %v3879_v27 = vld [vmem:[%s7034_s3 + $0x298] sm:$0xff]  ;;  %v6516_v9 = vpack.c.bf16 %v3876_v26, %v3874_v59  ;;  %v3931_v59 = vld [vmem:[%s7036_s5 + $0x70] sm:$0xff] }
 0x28a   : > { %3920 = vmatmul.mubr.msk.f32.vlgmr.msra.gmra.mrb[4].mxu1 %vm2130_vm3, %v2420_v20  ;;  %4890 = vmatprep.subr.bf16.mxu1 %v6442_v61  ;;  %v6520_v10 = vpack.c.bf16 %v3881_v28, %v3879_v27  ;;  %v3928_v4 = vld [vmem:[%s7036_s5 + $0x58] sm:$0xff] }
 0x28b   : > { %4772 = vmatpush1.bf16.msra.mxu0 %v6330_v3  ;;  %4892 = vmatpush1.bf16.msra.mxu1 %v6444_v8  ;;  %v3888_v3 = vld [vmem:[%s7034_s3 + $0x2c8] sm:$0xff]  ;;  %v3932_v26 = vld [vmem:[%s7036_s5 + $0x78] sm:$0xff] }
 0x28c   : > { %4774 = vmatprep.subr.bf16.mxu0 %v6334_v45  ;;  %4894 = vmatprep.subr.bf16.mxu1 %v6451_v21  ;;  %v3890_v45 = vld [vmem:[%s7034_s3 + $0x2d8] sm:$0xff]  ;;  %v4936_v28 = vpack.c.bf16 %v3932_v26, %v3931_v59 }
 0x28d   : > { %2388 = vmatprep.mubr.f32.mxu0 %v7062_v46  ;;  %2902 = vmatprep.mubr.f32.mxu1 %v7062_v46  ;;  %v3959_v59 = vld [vmem:[%s7036_s5 + $0x138] sm:$0xff] }
 0x28f   : > { %4776 = vmatpush1.bf16.msra.mxu0 %v6353_v19  ;;  %4896 = vmatpush1.bf16.msra.mxu1 %v6474_v48  ;;  %v3894_v19 = vld [vmem:[%s7034_s3 + $0x2f8] sm:$0xff] }
 0x290   : > { %4778 = vmatprep.subr.bf16.mxu0 %v6356_v24  ;;  %4898 = vmatprep.subr.bf16.mxu1 %v6478_v0  ;;  %v4809_v24 = vpack.c.bf16 %v3890_v45, %v3888_v3  ;;  %v4813_v31 = vpack.c.bf16 %v3894_v19, %v3892_v18  ;;  %v3935_v19 = vld [vmem:[%s7036_s5 + $0x90] sm:$0xff] }
 0x293   : > { %4780 = vmatpush1.bf16.msra.mxu0 %v6373_v37  ;;  %4900 = vmatpush1.bf16.msra.mxu1 %v6496_v40  ;;  %v3893_v37 = vld [vmem:[%s7034_s3 + $0x2f0] sm:$0xff] }
 0x294   : > { %4782 = vmatprep.subr.bf16.mxu0 %v6376_v42  ;;  %4902 = vmatprep.subr.bf16.mxu1 %v6500_v58  ;;  %v3896_v42 = vld [vmem:[%s7034_s3 + $0x308] sm:$0xff]  ;;  %v4815_v49 = vpack.c.bf16 %v3893_v37, %v3891_v36 }
 0x297   : > { %4784 = vmatpush1.bf16.msra.mxu0 %v6391_v56  ;;  %4904 = vmatpush1.bf16.msra.mxu1 %v6516_v9  ;;  %v3900_v56 = vld [vmem:[%s7034_s3 + $0x328] sm:$0xff] }
 0x298   : > { %4786 = vmatprep.subr.bf16.mxu0 %v6395_v57  ;;  %4906 = vmatprep.subr.bf16.mxu1 %v6520_v10  ;;  %v3902_v57 = vld [vmem:[%s7034_s3 + $0x338] sm:$0xff] }
 0x299   : > { %v4821_v63 = vpack.c.bf16 %v3902_v57, %v3900_v56  ;;  %v3950_v57 = vld [vmem:[%s7036_s5 + $0xf0] sm:$0xff] }
 0x29b   : > { %4788 = vmatpush1.bf16.msra.mxu0 %v6404_v5  ;;  %4908 = vmatpush1.bf16.msra.mxu1 %v6530_v55  ;;  %v3899_v5 = vld [vmem:[%s7034_s3 + $0x320] sm:$0xff] }
 0x29c   : > { %3859 = vmatprep.subr.msk.mxu0 %vm2134_vm1, %v6411_v15  ;;  %3921 = vmatprep.subr.msk.mxu1 %vm2134_vm1, %v6537_v54  ;;  %v3901_v15 = vld [vmem:[%s7034_s3 + $0x330] sm:$0xff] }
 0x29d   : > { %v4823_v34 = vpack.c.bf16 %v3901_v15, %v3899_v5  ;;  %v3939_v15 = vld [vmem:[%s7036_s5 + $0xa0] sm:$0xff] }
 0x29f   : > { %3860 = vmatpush1.msk.msra.mxu0 %vm2134_vm1, %v6434_v44  ;;  %3922 = vmatpush1.msk.msra.mxu1 %vm2134_vm1, %v3882_v13  ;;  %v3903_v44 = vld [vmem:[%s7034_s3 + $0x340] sm:$0xff] }
 0x2a0   : > { %3861 = vmatmul.mubr.msk.f32.vlgmr.msra.gmra.mrb[4].mxu0 %vm2130_vm3, %v2315_v14  ;;  %4790 = vmatprep.subr.bf16.mxu0 %v6442_v61  ;;  %v4817_v14 = vpack.c.bf16 %v3898_v43, %v3896_v42  ;;  %v4827_v60 = vpack.c.bf16 %v3905_v52, %v3903_v44  ;;  %v3908_v61 = vld [vmem:[%s7034_s3 + $0x368] sm:$0xf]  ;;  %v3952_v44 = vld [vmem:[%s7036_s5 + $0x100] sm:$0xff] }
 0x2a1   : > { %3923 = vmatmul.mubr.msk.f32.vlgmr.msra.gmra.mrb[4].mxu1 %vm2130_vm3, %v2525_v30  ;;  %4910 = vmatprep.subr.bf16.mxu1 %v4809_v24  ;;  %v3953_v52 = vld [vmem:[%s7036_s5 + $0x108] sm:$0xff] }
 0x2a2   : > { %4792 = vmatpush1.bf16.msra.mxu0 %v6444_v8  ;;  %4912 = vmatpush1.bf16.msra.mxu1 %v4811_v25  ;;  %v3907_v8 = vld [vmem:[%s7034_s3 + $0x360] sm:$0xf] }
 0x2a3   : > { %4794 = vmatprep.subr.bf16.mxu0 %v6451_v21  ;;  %4914 = vmatprep.subr.bf16.mxu1 %v4813_v31  ;;  %v2911_v21 = vrot.slane %v6332_v2, 2  ;;  %v3003_v2 = vld [vmem:[%s7036_s5] sm:$0xff] }
 0x2a4   : > { %2493 = vmatprep.mubr.f32.mxu0 %v7062_v46  ;;  %2978 = vmatprep.mubr.f32.mxu1 %v7062_v46 }
 0x2a6   : > { %4796 = vmatpush1.bf16.msra.mxu0 %v6474_v48  ;;  %4916 = vmatpush1.bf16.msra.mxu1 %v4815_v49  ;;  %v3006_v48 = vld [vmem:[%s7036_s5 + $0x18] sm:$0xff] }
 0x2a7   : > { %4798 = vmatprep.subr.bf16.mxu0 %v6478_v0  ;;  %4918 = vmatprep.subr.bf16.mxu1 %v4817_v14  ;;  %v4930_v0 = vpack.c.bf16 %v3928_v4, %v3927_v32  ;;  %v4948_v17 = vpack.c.bf16 %v3006_v48, %v3005_v47  ;;  %v3955_v32 = vld [vmem:[%s7036_s5 + $0x118] sm:$0xff]  ;;  %v3943_v4 = vld [vmem:[%s7036_s5 + $0xc0] sm:$0xff]  ;;  %v3944_v47 = vld [vmem:[%s7036_s5 + $0xc8] sm:$0xff] }
 0x2a8   : > { %v4966_v16 = vpack.c.bf16 %v3944_v47, %v3943_v4  ;;  %v3521_v47 = vld [vmem:[%s7040_s9 + $0x20] sm:$0xff] }
 0x2aa   : > { %4800 = vmatpush1.bf16.msra.mxu0 %v6496_v40  ;;  %4920 = vmatpush1.bf16.msra.mxu1 %v4819_v62  ;;  %v3007_v40 = vld [vmem:[%s7036_s5 + $0x20] sm:$0xff] }
 0x2ab   : > { %4802 = vmatprep.subr.bf16.mxu0 %v6500_v58  ;;  %4922 = vmatprep.subr.bf16.mxu1 %v4821_v63  ;;  %v3008_v58 = vld [vmem:[%s7036_s5 + $0x28] sm:$0xff] }
 0x2ac   : > { %v4951_v27 = vpack.c.bf16 %v3008_v58, %v3007_v40  ;;  %v3958_v58 = vld [vmem:[%s7036_s5 + $0x130] sm:$0xff] }
 0x2ae   : > { %4804 = vmatpush1.bf16.msra.mxu0 %v6516_v9  ;;  %4924 = vmatpush1.bf16.msra.mxu1 %v4823_v34  ;;  %v3009_v9 = vld [vmem:[%s7036_s5 + $0x30] sm:$0xff] }
 0x2af   : > { %4806 = vmatprep.subr.bf16.mxu0 %v6520_v10  ;;  %4926 = vmatprep.subr.bf16.mxu1 %v4825_v41  ;;  %v3010_v10 = vld [vmem:[%s7036_s5 + $0x38] sm:$0xff] }
 0x2b2   : > { %4808 = vmatpush1.bf16.msra.mxu0 %v6530_v55  ;;  %4928 = vmatpush1.bf16.msra.mxu1 %v4827_v60  ;;  %v4954_v55 = vpack.c.bf16 %v3010_v10, %v3009_v9  ;;  %v4987_v9 = vpack.c.bf16 %v3959_v59, %v3958_v58  ;;  %v3527_v59 = vld [vmem:[%s7040_s9 + $0x50] sm:$0xff] }
 0x2b3   : > { %3884 = vmatprep.subr.msk.mxu0 %vm2134_vm1, %v6537_v54  ;;  %3924 = vmatprep.subr.msk.mxu1 %vm2134_vm1, %v3908_v61  ;;  %v4939_v54 = vpack.c.bf16 %v3934_v11, %v3933_v29  ;;  %v3961_v29 = vld [vmem:[%s7036_s5 + $0x140] sm:$0xff]  ;;  %v3962_v11 = vld [vmem:[%s7036_s5 + $0x148] sm:$0xff] }
 0x2b6   : > { %3885 = vmatpush1.msk.msra.mxu0 %vm2134_vm1, %v3882_v13  ;;  %3925 = vmatpush1.msk.msra.mxu1 %vm2134_vm1, %v3907_v8  ;;  %v3012_v13 = vld [vmem:[%s7036_s5 + $0x48] sm:$0xff] }
 0x2b7   : > { %3886 = vmatmul.mubr.msk.f32.vlgmr.msra.gmra.mrb[4].mxu0 %vm2130_vm3, %v2420_v20  ;;  %4810 = vmatprep.subr.bf16.mxu0 %v4809_v24  ;;  %v3004_v20 = vld [vmem:[%s7036_s5 + $0x8] sm:$0xff]  ;;  %v4957_v18 = vpack.c.bf16 %v3012_v13, %v3011_v12  ;;  %v3936_v24 = vld [vmem:[%s7036_s5 + $0x98] sm:$0xff]  ;;  %v3965_v13 = vld [vmem:[%s7036_s5 + $0x160] sm:$0xff] }
 0x2b8   : > { %3926 = vmatmul.mubr.msk.f32.vlgmr.msra.gmra.mrb[4].mxu1 %vm2130_vm3, %v2911_v21  ;;  %4812 = vmatpush1.bf16.msra.mxu0 %v4811_v25  ;;  %v4945_v38 = vpack.c.bf16 %v3004_v20, %v3003_v2  ;;  %v2612_v25 = vrot.slane %v2607_v7, %v943_v53  ;;  %v3942_v21 = vld [vmem:[%s7036_s5 + $0xb8] sm:$0xff]  ;;  %v4978_v2 = vpack.c.bf16 %v3953_v52, %v3952_v44  ;;  %v3954_v20 = vld [vmem:[%s7036_s5 + $0x110] sm:$0xff]  ;;  %v3442_v44 = vld [vmem:[%s7038_s7 + $0x68] sm:$0xff] }
 0x2b9   : > { %4814 = vmatprep.subr.bf16.mxu0 %v4813_v31  ;;  %2598 = vmatprep.mubr.f32.mxu0 %v7062_v46  ;;  %v2616_v31 = vrot.slane %v2607_v7, %v947_v6  ;;  %v4981_v48 = vpack.c.bf16 %v3955_v32, %v3954_v20  ;;  %v3964_v7 = vld [vmem:[%s7036_s5 + $0x158] sm:$0xff]  ;;  %v3519_v20 = vld [vmem:[%s7040_s9 + $0x10] sm:$0xff] }
 0x2ba   : > { %4944 = vmatprep.subr.bf16.mxu1 %v5210_v35  ;;  %4107 = vmatprep.mubr.msk.f32.mxu1 %vm5211_vm4, %v7062_v46 }
 0x2bb   : > { %4946 = vmatpush3.bf16.msra.mxu1 %v4945_v38 }
 0x2bc   : > { %4816 = vmatpush1.bf16.msra.mxu0 %v4815_v49  ;;  %4947 = vmatprep.subr.bf16.mxu1 %v5210_v35 }
 0x2bd   : > { %4818 = vmatprep.subr.bf16.mxu0 %v4817_v14 }
 0x2bf   : > { %4949 = vmatpush3.bf16.msra.mxu1 %v4948_v17  ;;  %v3945_v17 = vld [vmem:[%s7036_s5 + $0xd0] sm:$0xff] }
 0x2c0   : > { %4820 = vmatpush1.bf16.msra.mxu0 %v4819_v62  ;;  %4950 = vmatprep.subr.bf16.mxu1 %v5210_v35  ;;  %v3951_v62 = vld [vmem:[%s7036_s5 + $0xf8] sm:$0xff] }
 0x2c1   : > { %4822 = vmatprep.subr.bf16.mxu0 %v4821_v63 }
 0x2c3   : > { %4952 = vmatpush3.bf16.msra.mxu1 %v4951_v27  ;;  %v3947_v27 = vld [vmem:[%s7036_s5 + $0xe0] sm:$0xff] }
 0x2c4   : > { %4824 = vmatpush1.bf16.msra.mxu0 %v4823_v34  ;;  %4953 = vmatprep.subr.bf16.mxu1 %v5210_v35  ;;  %v4975_v34 = vpack.c.bf16 %v3951_v62, %v3950_v57  ;;  %v3436_v57 = vld [vmem:[%s7038_s7 + $0x38] sm:$0xff] }
 0x2c5   : > { %4826 = vmatprep.subr.bf16.mxu0 %v4825_v41 }
 0x2c7   : > { %4955 = vmatpush3.bf16.msra.mxu1 %v4954_v55 }
 0x2c8   : > { %4828 = vmatpush1.bf16.msra.mxu0 %v4827_v60  ;;  %4956 = vmatprep.subr.bf16.mxu1 %v5210_v35  ;;  %v4960_v60 = vpack.c.bf16 %v3940_v22, %v3939_v15  ;;  %v3439_v22 = vld [vmem:[%s7038_s7 + $0x50] sm:$0xff] }
 0x2c9   : > { %3909 = vmatprep.subr.msk.mxu0 %vm2134_vm1, %v3908_v61 }
 0x2cb   : > { %4958 = vmatpush3.bf16.msra.mxu1 %v4957_v18  ;;  %v3966_v18 = vld [vmem:[%s7036_s5 + $0x168] sm:$0xff] }
 0x2cc   : > { %3910 = vmatpush1.msk.msra.mxu0 %vm2134_vm1, %v3907_v8  ;;  %4974 = vmatprep.subr.bf16.mxu1 %v5210_v35  ;;  %v3941_v8 = vld [vmem:[%s7036_s5 + $0xb0] sm:$0xff] }
 0x2cd   : > { %3911 = vmatmul.mubr.msk.f32.vlgmr.msra.gmra.mrb[4].mxu0 %vm2130_vm3, %v2525_v30  ;;  %4929 = vmatprep.subr.bf16.mxu0 %v5210_v35  ;;  %v4942_v30 = vpack.c.bf16 %v3936_v24, %v3935_v19  ;;  %v4963_v38 = vpack.c.bf16 %v3942_v21, %v3941_v8  ;;  %v4996_v19 = vpack.c.bf16 %v3966_v18, %v3965_v13  ;;  %v3967_v24 = vld [vmem:[%s7036_s5 + $0x170] sm:$0xff]  ;;  %v3517_v21 = vld [vmem:[%s7040_s9] sm:$0xff] }
 0x2ce   : > { %4931 = vmatpush3.bf16.msra.mxu0 %v4930_v0  ;;  %4084 = vmatprep.mubr.msk.f32.mxu0 %vm5211_vm4, %v7062_v46  ;;  %v3956_v0 = vld [vmem:[%s7036_s5 + $0x120] sm:$0xff] }
 0x2cf   : > { %4932 = vmatprep.subr.bf16.mxu0 %v5210_v35  ;;  %v4984_v40 = vpack.c.bf16 %v3957_v1, %v3956_v0  ;;  %v3523_v1 = vld [vmem:[%s7040_s9 + $0x30] sm:$0xff] }
 0x2d2   : > { %4934 = vmatpush3.bf16.msra.mxu0 %v4933_v39  ;;  %v3946_v39 = vld [vmem:[%s7036_s5 + $0xd8] sm:$0xff] }
 0x2d3   : > { %4935 = vmatprep.subr.bf16.mxu0 %v5210_v35  ;;  %v4969_v26 = vpack.c.bf16 %v3946_v39, %v3945_v17  ;;  %v3525_v39 = vld [vmem:[%s7040_s9 + $0x40] sm:$0xff] }
 0x2d6   : > { %4937 = vmatpush3.bf16.msra.mxu0 %v4936_v28  ;;  %v3948_v28 = vld [vmem:[%s7036_s5 + $0xe8] sm:$0xff] }
 0x2d7   : > { %4938 = vmatprep.subr.bf16.mxu0 %v5210_v35  ;;  %v4972_v10 = vpack.c.bf16 %v3948_v28, %v3947_v27  ;;  %v3529_v28 = vld [vmem:[%s7040_s9 + $0x60] sm:$0xff] }
 0x2da   : > { %4940 = vmatpush3.bf16.msra.mxu0 %v4939_v54  ;;  %v4990_v54 = vpack.c.bf16 %v3962_v11, %v3961_v29 }
 0x2db   : > { %4941 = vmatprep.subr.bf16.mxu0 %v5210_v35 }
 0x2de   : > { %4943 = vmatpush3.bf16.msra.mxu0 %v4942_v30 }
 0x2df   : > { %4959 = vmatprep.subr.bf16.mxu0 %v5210_v35 }
 0x38b   : > { %v2980_v3 = vpop.f32.mrb[4].mxu1 }
 0x38c   : > { %v2982_v45 = vpop.f32.mrb[5].mxu1  ;;  %v2987_v36 = vadd.f32 %v2980_v3, %v2612_v25 }
 0x38d   : > { %v2988_v37 = vadd.f32 %v2982_v45, %v2616_v31  ;;  %v3963_v45 = vld [vmem:[%s7036_s5 + $0x150] sm:$0xff] }
 0x38e   : > { %v2989_v23 = vmax.f32 %v2987_v36, 0.0  ;;  %v4993_v12 = vpack.c.bf16 %v3964_v7, %v3963_v45  ;;  %v3970_v36 = vld [vmem:[%s7036_s5 + $0x188] sm:$0xff] }
 0x38f   : > { %v2990_v14 = vmax.f32 %v2988_v37, 0.0 }
 0x3a0   : > { %v2600_v53 = vpop.f32.mrb[4].mxu0 }
 0x3a1   : > { %v2619_v42 = vadd.f32 %v2612_v25, %v2600_v53  ;;  %v2602_v43 = vpop.f32.mrb[5].mxu0  ;;  %v3968_v25 = vld [vmem:[%s7036_s5 + $0x178] sm:$0xff] }
 0x3a2   : > { %v2620_v49 = vadd.f32 %v2616_v31, %v2602_v43  ;;  %v4999_v30 = vpack.c.bf16 %v3968_v25, %v3967_v24  ;;  %v3969_v31 = vld [vmem:[%s7036_s5 + $0x180] sm:$0xff]  ;;  %v3430_v43 = vld [vmem:[%s7038_s7 + $0x8] sm:$0xff] }
 0x3a3   : > { %v2621_v6 = vmax.f32 %v2619_v42, 0.0  ;;  %v5002_v37 = vpack.c.bf16 %v3970_v36, %v3969_v31  ;;  %v3429_v42 = vld [vmem:[%s7038_s7] sm:$0xff] }
 0x3a4   : > { %v2622_v50 = vmax.f32 %v2620_v49, 0.0  ;;  %v5005_v49 = vpack.c.bf16 %v3430_v43, %v3429_v42  ;;  %v3426_v25 = vld [vmem:[%s7037_s6] sm:$0x1] }
 0x3a5   : > { %v2991_v51 = vmax.f32 %v2621_v6, %v2989_v23  ;;  %v3431_v23 = vld [vmem:[%s7038_s7 + $0x10] sm:$0xff]  ;;  %v3445_v43 = vld [vmem:[%s7039_s8] sm:$0x1] }
 0x3a6   : > { %v2992_v56 = vmax.f32 %v2622_v50, %v2990_v14  ;;  %v3433_v14 = vld [vmem:[%s7038_s7 + $0x20] sm:$0xff]  ;;  %v3434_v50 = vld [vmem:[%s7038_s7 + $0x28] sm:$0xff] }
 0x3a7   : > { %2995 = vrot.lane.b32.xlu0 %v2991_v51, %s5212_s24 }
 0x3a8   : > { %2997 = vrot.lane.b32.xlu1 %v2992_v56, %s5212_s24  ;;  %v5011_v56 = vpack.c.bf16 %v3434_v50, %v3433_v14  ;;  %v3533_v14 = vld [vmem:[%s7041_s10] sm:$0x1]  ;;  %s5213_s24 = smov [#allocation3]  }
 0x3a9   : > { %s5148_s25 = sshll.u32 %s5213_s24, 4  ;;  %s5149_s25 = int_to_ptr.vmem [resolvable:$false] %s5148_s25 }
 0x3aa   : > { %s5150_s0 = scalar_lea.vmem %s5149_s25, 32  ;;  %p5151_p2 = scmp.lt.s32.totalorder %s6989_s29, %s5149_s25 }
 0x3ab   : > { %p5152_p3 = scmp.lt.s32.totalorder %s5150_s0, %s5144_s22 }
 0x3ad   : > { %p5153_p4 = por %p5152_p3, %p5151_p2 }
 0x3af   : > { %p5154_p5 = pnand %p5153_p4, %p5147_p1 }
 0x419   : > { %v2996_v63 = vpop.permute.xlu0 %2995 }
 0x41a   : > { %v2998_v5 = vpop.permute.xlu1 %2997 }
 0x41b   : > { %v3000_v33 = vsel %vm2999_vm5, %v2996_v63, %v2998_v5  ;;  %v3437_v63 = vld [vmem:[%s7038_s7 + $0x40] sm:$0xff]  ;;  %v3438_v5 = vld [vmem:[%s7038_s7 + $0x48] sm:$0xff] }
 0x41c   : > { %v6747_v41 = vmax.f32 %v2991_v51, %v3000_v33  ;;  %v3435_v51 = vld [vmem:[%s7038_s7 + $0x30] sm:$0xff]  ;;  %v5017_v15 = vpack.c.bf16 %v3438_v5, %v3437_v63  ;;  %v3440_v33 = vld [vmem:[%s7038_s7 + $0x58] sm:$0xff] }
 0x41d   : > { %v5014_v62 = vpack.c.bf16 %v3436_v57, %v3435_v51 }
 0x41e   : > { %4108 = vmatmul.mubr.msk.f32.vlgmr.msra.gmra.mrb[6].mxu1 %vm3026_vm6, %v6747_v41  ;;  %v3025_v61 = vrot.slane %v6747_v41, 1  ;;  %v3267_v55 = vrot.slane %v6747_v41, 3  ;;  %v3182_v3 = vrot.slane %v6747_v41, 2  ;;  %v3352_v53 = vrot.slane %v6747_v41, 4  ;;  %v3441_v41 = vld [vmem:[%s7038_s7 + $0x60] sm:$0xff] }
 0x41f   : > { %4976 = vmatpush3.bf16.msra.mxu1 %v4975_v34  ;;  %4153 = vmatprep.mubr.msk.f32.mxu1 %vm5211_vm4, %v7062_v46  ;;  %v5020_v34 = vpack.c.bf16 %v3440_v33, %v3439_v22  ;;  %v5023_v52 = vpack.c.bf16 %v3442_v44, %v3441_v41 }
 0x420   : > { %4085 = vmatmul.mubr.msk.f32.vlgmr.msra.gmra.mrb[6].mxu0 %vm3026_vm6, %v3025_v61  ;;  %4977 = vmatprep.subr.bf16.mxu1 %v5210_v35  ;;  %v3444_v61 = vld [vmem:[%s7038_s7 + $0x78] sm:$0xff] }
 0x421   : > { %4961 = vmatpush3.bf16.msra.mxu0 %v4960_v60  ;;  %4130 = vmatprep.mubr.msk.f32.mxu0 %vm5211_vm4, %v7062_v46  ;;  %v3443_v60 = vld [vmem:[%s7038_s7 + $0x70] sm:$0xff] }
 0x422   : > { %4962 = vmatprep.subr.bf16.mxu0 %v5210_v35  ;;  %v5026_v8 = vpack.c.bf16 %v3444_v61, %v3443_v60 }
 0x423   : > { %4979 = vmatpush3.bf16.msra.mxu1 %v4978_v2  ;;  %v3518_v2 = vld [vmem:[%s7040_s9 + $0x8] sm:$0xff] }
 0x424   : > { %4980 = vmatprep.subr.bf16.mxu1 %v5210_v35  ;;  %v5029_v32 = vpack.c.bf16 %v3518_v2, %v3517_v21 }
 0x425   : > { %4964 = vmatpush3.bf16.msra.mxu0 %v4963_v38  ;;  %v3520_v38 = vld [vmem:[%s7040_s9 + $0x18] sm:$0xff] }
 0x426   : > { %4965 = vmatprep.subr.bf16.mxu0 %v5210_v35  ;;  %v5032_v4 = vpack.c.bf16 %v3520_v38, %v3519_v20 }
 0x427   : > { %4982 = vmatpush3.bf16.msra.mxu1 %v4981_v48  ;;  %v3522_v48 = vld [vmem:[%s7040_s9 + $0x28] sm:$0xff] }
 0x428   : > { %4983 = vmatprep.subr.bf16.mxu1 %v5210_v35  ;;  %v5035_v0 = vpack.c.bf16 %v3522_v48, %v3521_v47 }
 0x429   : > { %4967 = vmatpush3.bf16.msra.mxu0 %v4966_v16  ;;  %v3524_v16 = vld [vmem:[%s7040_s9 + $0x38] sm:$0xff] }
 0x42a   : > { %4968 = vmatprep.subr.bf16.mxu0 %v5210_v35  ;;  %v5038_v17 = vpack.c.bf16 %v3524_v16, %v3523_v1 }
 0x42b   : > { %4985 = vmatpush3.bf16.msra.mxu1 %v4984_v40  ;;  %v3526_v40 = vld [vmem:[%s7040_s9 + $0x48] sm:$0xff] }
 0x42c   : > { %4986 = vmatprep.subr.bf16.mxu1 %v5210_v35  ;;  %v5041_v58 = vpack.c.bf16 %v3526_v40, %v3525_v39 }
 0x42d   : > { %4970 = vmatpush3.bf16.msra.mxu0 %v4969_v26  ;;  %v3528_v26 = vld [vmem:[%s7040_s9 + $0x58] sm:$0xff] }
 0x42e   : > { %4971 = vmatprep.subr.bf16.mxu0 %v5210_v35  ;;  %v5044_v27 = vpack.c.bf16 %v3528_v26, %v3527_v59 }
 0x42f   : > { %4988 = vmatpush3.bf16.msra.mxu1 %v4987_v9  ;;  %v3530_v9 = vld [vmem:[%s7040_s9 + $0x68] sm:$0xff] }
 0x430   : > { %5004 = vmatprep.subr.bf16.mxu1 %v5210_v35 }
 0x431   : > { %4973 = vmatpush3.bf16.msra.mxu0 %v4972_v10  ;;  %v5047_v10 = vpack.c.bf16 %v3530_v9, %v3529_v28 }
 0x432   : > { %4154 = vmatmul.mubr.msk.f32.vlgmr.msra.gmra.mrb[8].mxu1 %vm3026_vm6, %v3267_v55  ;;  %4989 = vmatprep.subr.bf16.mxu0 %v5210_v35 }
 0x433   : > { %4211 = vmatprep.mubr.msk.f32.mxu1 %vm5211_vm4, %v7062_v46  ;;  %5006 = vmatpush3.bf16.msra.mxu1 %v5005_v49 }
 0x434   : > { %4131 = vmatmul.mubr.msk.f32.vlgmr.msra.gmra.mrb[8].mxu0 %vm3026_vm6, %v3182_v3  ;;  %5007 = vmatprep.subr.bf16.mxu1 %v5210_v35 }
 0x435   : > { %4991 = vmatpush3.bf16.msra.mxu0 %v4990_v54  ;;  %4176 = vmatprep.mubr.msk.f32.mxu0 %vm5211_vm4, %v7062_v46 }
 0x436   : > { %4992 = vmatprep.subr.bf16.mxu0 %v5210_v35 }
 0x439   : > { %4994 = vmatpush3.bf16.msra.mxu0 %v4993_v12 }
 0x43a   : > { %4995 = vmatprep.subr.bf16.mxu0 %v5210_v35 }
 0x43d   : > { %4997 = vmatpush3.bf16.msra.mxu0 %v4996_v19 }
 0x43e   : > { %4998 = vmatprep.subr.bf16.mxu0 %v5210_v35 }
 0x441   : > { %5000 = vmatpush3.bf16.msra.mxu0 %v4999_v30 }
 0x442   : > { %5001 = vmatprep.subr.bf16.mxu0 %v5210_v35 }
 0x445   : > { %5003 = vmatpush3.bf16.msra.mxu0 %v5002_v37  ;;  %v3531_v37 = vld [vmem:[%s7040_s9 + $0x70] sm:$0xff] }
 0x446   : > { %5028 = vmatprep.subr.bf16.mxu0 %v5210_v35 }
 0x448   : > { %4177 = vmatmul.mubr.msk.f32.vlgmr.msra.gmra.mrb[10].mxu0 %vm3026_vm6, %v3352_v53  ;;  %v3532_v53 = vld [vmem:[%s7040_s9 + $0x78] sm:$0xff] }
 0x449   : > { %4246 = vmatprep.mubr.msk.f32.mxu0 %vm5211_vm4, %v7062_v46  ;;  %v3432_v46 = vld [vmem:[%s7038_s7 + $0x18] sm:$0xff]  ;;  %5030 = vmatpush3.bf16.msra.mxu0 %v5029_v32  ;;  %v5050_v42 = vpack.c.bf16 %v3532_v53, %v3531_v37 }
 0x44a   : > { %v5008_v6 = vpack.c.bf16 %v3432_v46, %v3431_v23  ;;  %5031 = vmatprep.subr.bf16.mxu0 %v5210_v35 }
 0x44c   : > { %5009 = vmatpush3.bf16.msra.mxu1 %v5008_v6 }
 0x44d   : > { %5010 = vmatprep.subr.bf16.mxu1 %v5210_v35  ;;  %5033 = vmatpush3.bf16.msra.mxu0 %v5032_v4 }
 0x44e   : > { %5034 = vmatprep.subr.bf16.mxu0 %v5210_v35 }
 0x450   : > { %5012 = vmatpush3.bf16.msra.mxu1 %v5011_v56 }
 0x451   : > { %5013 = vmatprep.subr.bf16.mxu1 %v5210_v35  ;;  %5036 = vmatpush3.bf16.msra.mxu0 %v5035_v0 }
 0x452   : > { %5037 = vmatprep.subr.bf16.mxu0 %v5210_v35 }
 0x454   : > { %5015 = vmatpush3.bf16.msra.mxu1 %v5014_v62 }
 0x455   : > { %5016 = vmatprep.subr.bf16.mxu1 %v5210_v35  ;;  %5039 = vmatpush3.bf16.msra.mxu0 %v5038_v17 }
 0x456   : > { %5040 = vmatprep.subr.bf16.mxu0 %v5210_v35 }
 0x458   : > { %5018 = vmatpush3.bf16.msra.mxu1 %v5017_v15 }
 0x459   : > { %5019 = vmatprep.subr.bf16.mxu1 %v5210_v35  ;;  %5042 = vmatpush3.bf16.msra.mxu0 %v5041_v58 }
 0x45a   : > { %5043 = vmatprep.subr.bf16.mxu0 %v5210_v35 }
 0x45c   : > { %5021 = vmatpush3.bf16.msra.mxu1 %v5020_v34 }
 0x45d   : > { %5022 = vmatprep.subr.bf16.mxu1 %v5210_v35  ;;  %5045 = vmatpush3.bf16.msra.mxu0 %v5044_v27 }
 0x45e   : > { %5046 = vmatprep.subr.bf16.mxu0 %v5210_v35 }
 0x460   : > { %5024 = vmatpush3.bf16.msra.mxu1 %v5023_v52 }
 0x461   : > { %5025 = vmatprep.subr.bf16.mxu1 %v5210_v35  ;;  %5048 = vmatpush3.bf16.msra.mxu0 %v5047_v10 }
 0x462   : > { %5049 = vmatprep.subr.bf16.mxu0 %v5210_v35 }
 0x464   : > { %5027 = vmatpush3.bf16.msra.mxu1 %v5026_v8 }
 0x465   : > { %5051 = vmatpush3.bf16.msra.mxu0 %v5050_v42 }
 0x4f1   : > { %v3167_v29 = vpop.f32.mrb[6].mxu1 }
 0x4f2   : > { %v4109_v11 = vpop.f32.mrb[7].mxu1 }
 0x4f3   : > { %v3095_v55 = vpop.f32.mrb[6].mxu0 }
 0x4f4   : > { %v3168_v54 = vadd.f32 %v3167_v29, %v3095_v55  ;;  %v4086_v3 = vpop.f32.mrb[7].mxu0 }
 0x505   : > { %v3336_v45 = vpop.f32.mrb[8].mxu1 }
 0x506   : > { %v4155_v7 = vpop.f32.mrb[9].mxu1 }
 0x507   : > { %v3251_v12 = vpop.f32.mrb[8].mxu0 }
 0x508   : > { %v3255_v13 = vadd.f32 %v3251_v12, %v3168_v54  ;;  %v4132_v18 = vpop.f32.mrb[9].mxu0 }
 0x50a   : > { %v3340_v19 = vadd.f32 %v3336_v45, %v3255_v13 }
 0x51b   : > { %v3421_v24 = vpop.f32.mrb[10].mxu0 }
 0x51c   : > { %v3425_v30 = vadd.f32 %v3421_v24, %v3340_v19  ;;  %v4178_v31 = vpop.f32.mrb[11].mxu0 }
 0x51e   : > { %v3427_v35 = vadd.f32 %v3426_v25, %v3425_v30 }
 0x520   : > { %v3428_v36 = vmax.f32 %v3427_v35, 0.0 }
 0x522   : > { %4212 = vmatmul.mubr.f32.vlgmr.msra.gmra.mrb[10].mxu1 %v3428_v36 }
 0x5f5   : > { %v3512_v49 = vpop.f32.mrb[10].mxu1 }
 0x5f6   : > { %v3513_v23 = vadd.f32 %v3512_v49, %v3445_v43  ;;  %v4213_v46 = vpop.f32.mrb[11].mxu1 }
 0x5f8   : > { %v3516_v6 = vmax.f32 %v3513_v23, 0.0 }
 0x5fa   : > { %4247 = vmatmul.mubr.f32.vlgmr.msra.gmra.mrb[12].mxu0 %v3516_v6 }
 0x6cd   : > { %v3600_v50 = vpop.f32.mrb[12].mxu0 }
 0x6ce   : > { %v3601_v51 = vadd.f32 %v3600_v50, %v3533_v14  ;;  %v4248_v56 = vpop.f32.mrb[13].mxu0 }
 0x6d0   : > { %3605 = vst.msk [vmem:[%s429_s13] sm:$0x1] %vm3604_vm7, %v3601_v51 }
 0x6d1   : > { %5157 = shalt.err (!%p5154_p5)
}
 0x6d2   : > { %s5158_s30 = scalar_lea.hbm %s6987_s21, 16  ;;  %s5162_s14 = scalar_lea.hbm %s7042_s11, 32 }
 0x6d3   : > { %p5159_p7 = scmp.ne.s32.totalorder %s6987_s21, %s5158_s30  ;;  %p5163_p12 = scmp.lt.u32.totalorder %s6987_s21, %s7042_s11 }
 0x6d4   : > { %p5164_p13 = scmp.lt.u32.totalorder %s5162_s14, %s5158_s30  ;;  %p5166_p1 = scmp.lt.u32.totalorder %s5158_s30, %s6987_s21 }
 0x6d5   : > { %p5160_p10 = pnand %p5159_p7, %p5312_p6 }
 0x6d6   : > { %p5165_p0 = por %p5164_p13, %p5163_p12 }
 0x6d7   : > { %p5161_p11 = pneg %p5160_p10 }
 0x6d8   : > { %p5167_p2 = por %p5166_p1, %p5165_p0 }
 0x6da   : > { %p5168_p3 = pnand %p5167_p2, %p5161_p11 }
 0x6dc   : > { %5171 = shalt.err (!%p5168_p3)
}
 0x6dd   : > { %5100 = dma.vmem_to_hbm [thread:$0]  (%p5312_p6), %s6989_s29, 16, %s6987_s21, %s3607_s16  }
 0x6de PF: > { %s3631_s0 = sand.u32 1, %s5194_s17   ;;  %p5103_p4 = pnand %p3682_p9, %p5316_p8 }
 0x6df   : > { %s3632_s22 = scalar_lea.sflag [#allocation4], %s3631_s0 }
 0x6e0   : > { %5189 = dma.done.wait (!%p5103_p4), %s3632_s22, 16  }
 0x6e1   : > { %5191 = vsyncadd (!%p5103_p4), %s3632_s22, 4294967280  ;;  %p21_p5 = scmp.ge.s32.totalorder %s5297_s23, 4   ;;  %s7068_s17 = smov %s5198_s18 }
 0x6e2   : > { %s7069_s18 = smov %s5202_s19  ;;  %s7070_s19 = smov %s5310_s26 }
 0x6e3   : > { %s7071_s20 = smov %s5297_s23  ;;  %23 = sbr.rel (!%p21_p5) target bundleno = 5 (0x5), region = 157 }
 0x6ea   :  { %3636 = vsyncpa [#allocation4], 1 }
 0x6eb   :  { %3638 = vsyncpa [#allocation4 + $0x1], 1 }

</bundles_post_ra>
